<compile_context>
chip_gen: v7x
topology: tpu7x:2x2x1
jax: 0.10.0
libtpu: 0.0.40
codegen_flags: <defaults>
</compile_context>

<pallas_src>
import math

import jax
import jax.numpy as jnp
from jax import lax
from jax.experimental import pallas as pl
from jax.experimental.pallas import tpu as pltpu

# ---- model hyper-parameters (small, consistent with the module __init__) ----
B, S, F = 2, 8, 4                  # batch, seq_len, num_features
D_MODEL = 32
NHEAD = 4
HEAD_DIM = D_MODEL // NHEAD
NUM_LAYERS = 2
DFF = 64
HORIZON = 4
NUM_TGT = 2
OUT_DIM = HORIZON * NUM_TGT
EPS = 1e-5                         # nn.LayerNorm default eps
SQRT_D = math.sqrt(D_MODEL)
ATTN_SCALE = 1.0 / math.sqrt(HEAD_DIM)
BS = B * S
WIDE = max(D_MODEL, DFF)           # lane width of the packed slabs (64)
NEG_INF = -1e30

# ---- big weight slab row layout (lane width WIDE, all blocks 8-row aligned) --
WS_WK = 0                          # (D, D)  K projection (full, all heads)
WS_WO = D_MODEL                    # (D, D)  attention output projection
WS_FF1 = 2 * D_MODEL               # (D, DFF)
WS_FF2 = 3 * D_MODEL               # (DFF, D)
WS_LAYER = 3 * D_MODEL + DFF       # 160 rows per layer
R_EMB = NUM_LAYERS * WS_LAYER      # (F, D)  input embedding (sqrt(D) folded)
R_OUT = R_EMB + 8                  # (D, OUT_DIM) output projection (8-aligned)
WS_ROWS = R_OUT + D_MODEL          # 360

# ---- small-parameter slab row layout (lane width WIDE) -----------------------
SM_PE = 0                          # rows 0:BS   pe tiled + b_emb*sqrt(D)
SM_BOUT = BS                       # row  16     output bias (OUT_DIM lanes)
SM_LAYER0 = 24                     # per-layer block start (8-aligned)
SM_LAYER = 16                      # rows per layer
SL_LN1W, SL_LN1B, SL_LN2W, SL_LN2B = 0, 1, 2, 3
SL_BK, SL_BO, SL_BFF1, SL_BFF2 = 4, 5, 6, 7
SL_BQ = 8                          # +hh : per-head Q bias (scaled)
SL_BV = 8 + NHEAD                  # +hh : per-head V bias
SM_MASK = SM_LAYER0 + NUM_LAYERS * SM_LAYER   # rows 56:72  (BS, BS) batch mask
SM_ROWS = SM_MASK + BS             # 72


# ------------------------------ shared math ---------------------------------
def _layer_norm(x, w, b):
    mu = jnp.mean(x, axis=-1, keepdims=True)
    var = jnp.mean((x - mu) ** 2, axis=-1, keepdims=True)
    return (x - mu) * lax.rsqrt(var + EPS) * w + b


def _gelu(x):
    # exact (erf) GELU, matching PyTorch activation='gelu'
    return 0.5 * x * (1.0 + lax.erf(x * 0.7071067811865476))


# --------------------------- fused forward kernel ----------------------------
def fused_forward_kernel(src_ref, w_qv_ref, w_slab_ref, smalls_ref, o_ref):
    f32 = jnp.float32

    # ---- input embedding (sqrt(d_model) pre-folded) + positional encoding ----
    w_emb = w_slab_ref[R_EMB:R_EMB + F, 0:D_MODEL]
    x = jnp.dot(src_ref[...], w_emb, preferred_element_type=f32)
    x = x + smalls_ref[SM_PE:SM_PE + BS, 0:D_MODEL]     # pe (tiled) + b_emb
    # TODO(synk): dropout layers (p=0.1) are identity here (inference-mode
    # semantics), consistent with the pure-JAX reference.

    # block-diagonal batch mask (0 same-batch, -1e30 cross-batch), loaded once
    mask = smalls_ref[SM_MASK:SM_MASK + BS, 0:BS]

    for l in range(NUM_LAYERS):
        base = SM_LAYER0 + l * SM_LAYER
        wrow = l * WS_LAYER

        ln1w = smalls_ref[base + SL_LN1W:base + SL_LN1W + 1, 0:D_MODEL]
        ln1b = smalls_ref[base + SL_LN1B:base + SL_LN1B + 1, 0:D_MODEL]
        ln2w = smalls_ref[base + SL_LN2W:base + SL_LN2W + 1, 0:D_MODEL]
        ln2b = smalls_ref[base + SL_LN2B:base + SL_LN2B + 1, 0:D_MODEL]
        b_k = smalls_ref[base + SL_BK:base + SL_BK + 1, 0:D_MODEL]
        b_o = smalls_ref[base + SL_BO:base + SL_BO + 1, 0:D_MODEL]
        b_f1 = smalls_ref[base + SL_BFF1:base + SL_BFF1 + 1, 0:DFF]
        b_f2 = smalls_ref[base + SL_BFF2:base + SL_BFF2 + 1, 0:D_MODEL]

        # ---------------- multi-head self-attention (pre-norm) ----------------
        h = _layer_norm(x, ln1w, ln1b)

        # K for all heads in one D-wide matmul, ONE transpose per layer; each
        # per-head K^T is then a cheap 8-aligned sublane slice (no per-head
        # transposes, no lane-offset slices).
        w_k = w_slab_ref[wrow + WS_WK:wrow + WS_WK + D_MODEL, 0:D_MODEL]
        k_all = jnp.dot(h, w_k, preferred_element_type=f32) + b_k     # (BS, D)
        kT = jnp.transpose(k_all)                                      # (D, BS)

        o_heads = []
        for hh in range(NHEAD):
            lo = hh * HEAD_DIM
            b_q = smalls_ref[base + SL_BQ + hh:base + SL_BQ + hh + 1, 0:HEAD_DIM]
            b_v = smalls_ref[base + SL_BV + hh:base + SL_BV + hh + 1, 0:HEAD_DIM]
            # per-head projections start at lane 0 (1/sqrt(head_dim) folded in Q)
            q_h = jnp.dot(h, w_qv_ref[l, hh], preferred_element_type=f32) + b_q
            v_h = jnp.dot(h, w_qv_ref[l, NHEAD + hh],
                          preferred_element_type=f32) + b_v
            # scores for ALL batch rows at once; cross-batch keys masked out
            # additively BEFORE max-subtraction / exp.
            sc = jnp.dot(q_h, kT[lo:lo + HEAD_DIM, :],
                         preferred_element_type=f32) + mask
            sc = sc - jnp.max(sc, axis=-1, keepdims=True)
            p = jnp.exp(sc)
            p = p * pl.reciprocal(jnp.sum(p, axis=-1, keepdims=True),
                                  approx=False)
            o_heads.append(jnp.dot(p, v_h, preferred_element_type=f32))

        # head recombination: uninterrupted matmul-accumulate chain through
        # per-head sublane slices of Wo (no lane concatenation).
        w_o = w_slab_ref[wrow + WS_WO:wrow + WS_WO + D_MODEL, 0:D_MODEL]
        attn = jnp.dot(o_heads[0], w_o[0:HEAD_DIM, :],
                       preferred_element_type=f32)
        for hh in range(1, NHEAD):
            lo = hh * HEAD_DIM
            attn = attn + jnp.dot(o_heads[hh], w_o[lo:lo + HEAD_DIM, :],
                                  preferred_element_type=f32)
        x = x + attn + b_o

        # ------------------------ feed-forward (pre-norm) ----------------------
        h2 = _layer_norm(x, ln2w, ln2b)
        w_f1 = w_slab_ref[wrow + WS_FF1:wrow + WS_FF1 + D_MODEL, 0:DFF]
        w_f2 = w_slab_ref[wrow + WS_FF2:wrow + WS_FF2 + DFF, 0:D_MODEL]
        ff = _gelu(jnp.dot(h2, w_f1, preferred_element_type=f32) + b_f1)
        ff = jnp.dot(ff, w_f2, preferred_element_type=f32) + b_f2
        x = x + ff

    # ---- output projection for all rows; host selects last-token rows ----
    w_out = w_slab_ref[R_OUT:R_OUT + D_MODEL, 0:OUT_DIM]
    b_out = smalls_ref[SM_BOUT:SM_BOUT + 1, 0:OUT_DIM]
    o_ref[...] = jnp.dot(x, w_out, preferred_element_type=f32) + b_out


# ------------------------------ pallas_call wrapper ---------------------------
def _full_spec(arr):
    zeros = (0,) * arr.ndim
    return pl.BlockSpec(arr.shape, lambda i, _z=zeros: _z)


def aqi_transformer_forward(src, kp):
    args = (src.reshape(BS, F), kp["w_qv"], kp["w_slab"], kp["smalls"])
    out_all = pl.pallas_call(
        fused_forward_kernel,
        out_shape=jax.ShapeDtypeStruct((BS, OUT_DIM), jnp.float32),
        grid=(1,),
        in_specs=[_full_spec(a) for a in args],
        out_specs=pl.BlockSpec((BS, OUT_DIM), lambda i: (0, 0)),
        compiler_params=pltpu.CompilerParams(
            dimension_semantics=("arbitrary",)),
    )(*args)
    # last token of each sequence (rows S-1, 2S-1, ...), then (B, HORIZON, TGT)
    return out_all[S - 1::S].reshape(B, HORIZON, NUM_TGT)


# ------------------------------ parameter setup -------------------------------
def make_pe(seq_len, d_model):
    pos = jnp.arange(seq_len, dtype=jnp.float32)[:, None]
    div = jnp.exp(jnp.arange(0, d_model, 2, dtype=jnp.float32)
                  * (-math.log(10000.0) / d_model))
    pe = jnp.zeros((seq_len, d_model), jnp.float32)
    pe = pe.at[:, 0::2].set(jnp.sin(pos * div))
    pe = pe.at[:, 1::2].set(jnp.cos(pos * div))      # d_model is even here
    return pe


def init_params(key):
    def w(k, shape, scale=0.1):
        return scale * jax.random.normal(k, shape, jnp.float32)

    keys = iter(jax.random.split(key, 4 + NUM_LAYERS * 12))
    params = {
        "w_emb": w(next(keys), (F, D_MODEL)),
        "b_emb": w(next(keys), (D_MODEL,)),
        "w_out": w(next(keys), (D_MODEL, OUT_DIM)),
        "b_out": w(next(keys), (OUT_DIM,)),
        "layers": [],
    }
    for _ in range(NUM_LAYERS):
        lp = dict(
            ln1w=jnp.ones((D_MODEL,), jnp.float32),
            ln1b=jnp.zeros((D_MODEL,), jnp.float32),
            wq=w(next(keys), (D_MODEL, D_MODEL)), bq=w(next(keys), (D_MODEL,)),
            wk=w(next(keys), (D_MODEL, D_MODEL)), bk=w(next(keys), (D_MODEL,)),
            wv=w(next(keys), (D_MODEL, D_MODEL)), bv=w(next(keys), (D_MODEL,)),
            wo=w(next(keys), (D_MODEL, D_MODEL)), bo=w(next(keys), (D_MODEL,)),
            ln2w=jnp.ones((D_MODEL,), jnp.float32),
            ln2b=jnp.zeros((D_MODEL,), jnp.float32),
            w1=w(next(keys), (D_MODEL, DFF)), b1=w(next(keys), (DFF,)),
            w2=w(next(keys), (DFF, D_MODEL)), b2=w(next(keys), (D_MODEL,)),
        )
        params["layers"].append(lp)
    return params


def pack_kernel_params(params, pe):
    """Fold static scales into weights and pack everything into 3 slabs + the
    per-head QV weights (4 kernel inputs total -> few DMA descriptors)."""
    w_qv = jnp.zeros((NUM_LAYERS, 2 * NHEAD, D_MODEL, HEAD_DIM), jnp.float32)
    w_slab = jnp.zeros((WS_ROWS, WIDE), jnp.float32)
    smalls = jnp.zeros((SM_ROWS, WIDE), jnp.float32)

    # embedding / output / positional pieces (sqrt(d_model) folded)
    w_slab = w_slab.at[R_EMB:R_EMB + F, 0:D_MODEL].set(params["w_emb"] * SQRT_D)
    w_slab = w_slab.at[R_OUT:R_OUT + D_MODEL, 0:OUT_DIM].set(params["w_out"])
    smalls = smalls.at[SM_PE:SM_PE + BS, 0:D_MODEL].set(
        jnp.tile(pe, (B, 1)) + params["b_emb"][None, :] * SQRT_D)
    smalls = smalls.at[SM_BOUT, 0:OUT_DIM].set(params["b_out"])

    # additive block-diagonal batch mask for merged-batch attention
    bid = jnp.arange(BS) // S
    mask = jnp.where(bid[:, None] == bid[None, :], 0.0, NEG_INF)
    smalls = smalls.at[SM_MASK:SM_MASK + BS, 0:BS].set(mask)

    for l, lp in enumerate(params["layers"]):
        wrow = l * WS_LAYER
        base = SM_LAYER0 + l * SM_LAYER
        w_slab = w_slab.at[wrow + WS_WK:wrow + WS_WK + D_MODEL,
                           0:D_MODEL].set(lp["wk"])
        w_slab = w_slab.at[wrow + WS_WO:wrow + WS_WO + D_MODEL,
                           0:D_MODEL].set(lp["wo"])
        w_slab = w_slab.at[wrow + WS_FF1:wrow + WS_FF1 + D_MODEL,
                           0:DFF].set(lp["w1"])
        w_slab = w_slab.at[wrow + WS_FF2:wrow + WS_FF2 + DFF,
                           0:D_MODEL].set(lp["w2"])
        smalls = smalls.at[base + SL_LN1W, 0:D_MODEL].set(lp["ln1w"])
        smalls = smalls.at[base + SL_LN1B, 0:D_MODEL].set(lp["ln1b"])
        smalls = smalls.at[base + SL_LN2W, 0:D_MODEL].set(lp["ln2w"])
        smalls = smalls.at[base + SL_LN2B, 0:D_MODEL].set(lp["ln2b"])
        smalls = smalls.at[base + SL_BK, 0:D_MODEL].set(lp["bk"])
        smalls = smalls.at[base + SL_BO, 0:D_MODEL].set(lp["bo"])
        smalls = smalls.at[base + SL_BFF1, 0:DFF].set(lp["b1"])
        smalls = smalls.at[base + SL_BFF2, 0:D_MODEL].set(lp["b2"])
        for hh in range(NHEAD):
            sl = slice(hh * HEAD_DIM, (hh + 1) * HEAD_DIM)
            w_qv = w_qv.at[l, hh].set(lp["wq"][:, sl] * ATTN_SCALE)
            w_qv = w_qv.at[l, NHEAD + hh].set(lp["wv"][:, sl])
            smalls = smalls.at[base + SL_BQ + hh,
                               0:HEAD_DIM].set(lp["bq"][sl] * ATTN_SCALE)
            smalls = smalls.at[base + SL_BV + hh,
                               0:HEAD_DIM].set(lp["bv"][sl])
    return {"w_qv": w_qv, "w_slab": w_slab, "smalls": smalls}


# ------------------------------ pure-JAX reference ----------------------------
def reference_forward(src, params, pe):
    x = (src @ params["w_emb"] + params["b_emb"]) * SQRT_D + pe[None]
    for lp in params["layers"]:
        def layer(xb, lp=lp):
            h = _layer_norm(xb, lp["ln1w"], lp["ln1b"])
            q = h @ lp["wq"] + lp["bq"]
            k = h @ lp["wk"] + lp["bk"]
            v = h @ lp["wv"] + lp["bv"]
            heads = []
            for hh in range(NHEAD):
                sl = slice(hh * HEAD_DIM, (hh + 1) * HEAD_DIM)
                sc = (q[:, sl] @ k[:, sl].T) * ATTN_SCALE
                p = jax.nn.softmax(sc, axis=-1)
                heads.append(p @ v[:, sl])
            attn = jnp.concatenate(heads, axis=-1) @ lp["wo"] + lp["bo"]
            xb = xb + attn
            h2 = _layer_norm(xb, lp["ln2w"], lp["ln2b"])
            ff = _gelu(h2 @ lp["w1"] + lp["b1"]) @ lp["w2"] + lp["b2"]
            return xb + ff
        x = jax.vmap(layer)(x)
    out = x[:, -1, :] @ params["w_out"] + params["b_out"]
    return out.reshape(B, HORIZON, NUM_TGT)


# ------------------------------ main ------------------------------------------
if __name__ == "__main__":
    key = jax.random.PRNGKey(0)
    k_src, k_par = jax.random.split(key)
    src = jax.random.normal(k_src, (B, S, F), jnp.float32)
    params = init_params(k_par)
    pe = make_pe(S, D_MODEL)
    kp = pack_kernel_params(params, pe)

    fwd = jax.jit(aqi_transformer_forward)
    out = jax.block_until_ready(fwd(src, kp))

    ref = jax.block_until_ready(reference_forward(src, params, pe))
    assert out.shape == (B, HORIZON, NUM_TGT)
    assert jnp.allclose(out, ref, atol=1e-4, rtol=1e-4), "mismatch vs reference"
    print("KERNEL_OK")
</pallas_src>

<mosaic_0001>
module attributes {stable_mosaic.version = 11 : i64} {
  func.func @fused_forward_kernel(%arg0: i32, %arg1: memref<16x4xf32, #tpu.memory_space<vmem>>, %arg2: memref<2x8x32x8xf32, #tpu.memory_space<vmem>>, %arg3: memref<360x64xf32, #tpu.memory_space<vmem>>, %arg4: memref<72x64xf32, #tpu.memory_space<vmem>>, %arg5: memref<16x8xf32, #tpu.memory_space<vmem>>) attributes {dimension_semantics = [#tpu.dimension_semantics<arbitrary>], iteration_bounds = array<i64: 1>, scalar_prefetch = 0 : i64, scratch_operands = 0 : i64, tpu.core_type = #tpu.core_type<tc>, window_params = [{pipeline_mode = #tpu.pipeline_mode<synchronous>, transform_indices = @transform_0, window_bounds = array<i64: 16, 4>}, {pipeline_mode = #tpu.pipeline_mode<synchronous>, transform_indices = @transform_1, window_bounds = array<i64: 2, 8, 32, 8>}, {pipeline_mode = #tpu.pipeline_mode<synchronous>, transform_indices = @transform_2, window_bounds = array<i64: 360, 64>}, {pipeline_mode = #tpu.pipeline_mode<synchronous>, transform_indices = @transform_3, window_bounds = array<i64: 72, 64>}, {pipeline_mode = #tpu.pipeline_mode<synchronous>, transform_indices = @transform_4, window_bounds = array<i64: 16, 8>}]} {
    %c320 = arith.constant 320 : index
    %c0 = arith.constant 0 : index
    %0 = vector.load %arg3[%c320, %c0] : memref<360x64xf32, #tpu.memory_space<vmem>>, vector<4x32xf32>
    %c0_0 = arith.constant 0 : index
    %c0_1 = arith.constant 0 : index
    %1 = vector.load %arg1[%c0_0, %c0_1] : memref<16x4xf32, #tpu.memory_space<vmem>>, vector<16x4xf32>
    %cst = arith.constant dense<0.000000e+00> : vector<16x32xf32>
    %2 = tpu.matmul %1, %0, %cst {dimension_numbers = #tpu.dot_dimension_numbers<[1], [0], [0], [1], [0, 0, 1, 1], [], []>} : vector<16x4xf32>, vector<4x32xf32>, vector<16x32xf32> -> vector<16x32xf32>
    %c0_2 = arith.constant 0 : index
    %c0_3 = arith.constant 0 : index
    %3 = vector.load %arg4[%c0_2, %c0_3] : memref<72x64xf32, #tpu.memory_space<vmem>>, vector<16x32xf32>
    %4 = arith.addf %2, %3 : vector<16x32xf32>
    %c56 = arith.constant 56 : index
    %c0_4 = arith.constant 0 : index
    %5 = vector.load %arg4[%c56, %c0_4] : memref<72x64xf32, #tpu.memory_space<vmem>>, vector<16x16xf32>
    %c24 = arith.constant 24 : index
    %c0_5 = arith.constant 0 : index
    %6 = vector.load %arg4[%c24, %c0_5] : memref<72x64xf32, #tpu.memory_space<vmem>>, vector<1x32xf32>
    %c25 = arith.constant 25 : index
    %c0_6 = arith.constant 0 : index
    %7 = vector.load %arg4[%c25, %c0_6] : memref<72x64xf32, #tpu.memory_space<vmem>>, vector<1x32xf32>
    %c26 = arith.constant 26 : index
    %c0_7 = arith.constant 0 : index
    %8 = vector.load %arg4[%c26, %c0_7] : memref<72x64xf32, #tpu.memory_space<vmem>>, vector<1x32xf32>
    %c27 = arith.constant 27 : index
    %c0_8 = arith.constant 0 : index
    %9 = vector.load %arg4[%c27, %c0_8] : memref<72x64xf32, #tpu.memory_space<vmem>>, vector<1x32xf32>
    %c28 = arith.constant 28 : index
    %c0_9 = arith.constant 0 : index
    %10 = vector.load %arg4[%c28, %c0_9] : memref<72x64xf32, #tpu.memory_space<vmem>>, vector<1x32xf32>
    %c29 = arith.constant 29 : index
    %c0_10 = arith.constant 0 : index
    %11 = vector.load %arg4[%c29, %c0_10] : memref<72x64xf32, #tpu.memory_space<vmem>>, vector<1x32xf32>
    %c30 = arith.constant 30 : index
    %c0_11 = arith.constant 0 : index
    %12 = vector.load %arg4[%c30, %c0_11] : memref<72x64xf32, #tpu.memory_space<vmem>>, vector<1x64xf32>
    %c31 = arith.constant 31 : index
    %c0_12 = arith.constant 0 : index
    %13 = vector.load %arg4[%c31, %c0_12] : memref<72x64xf32, #tpu.memory_space<vmem>>, vector<1x32xf32>
    %cst_13 = arith.constant dense<0.000000e+00> : vector<16xf32>
    %14 = vector.multi_reduction <add>, %4, %cst_13 [1] : vector<16x32xf32> to vector<16xf32>
    %15 = vector.shape_cast %14 : vector<16xf32> to vector<16x1xf32>
    %cst_14 = arith.constant 3.200000e+01 : f32
    %16 = vector.broadcast %cst_14 : f32 to vector<16x1xf32>
    %17 = arith.divf %15, %16 : vector<16x1xf32>
    %18 = vector.broadcast %17 : vector<16x1xf32> to vector<16x32xf32>
    %19 = arith.subf %4, %18 : vector<16x32xf32>
    %20 = arith.mulf %19, %19 : vector<16x32xf32>
    %cst_15 = arith.constant dense<0.000000e+00> : vector<16xf32>
    %21 = vector.multi_reduction <add>, %20, %cst_15 [1] : vector<16x32xf32> to vector<16xf32>
    %22 = vector.shape_cast %21 : vector<16xf32> to vector<16x1xf32>
    %cst_16 = arith.constant 3.200000e+01 : f32
    %23 = vector.broadcast %cst_16 : f32 to vector<16x1xf32>
    %24 = arith.divf %22, %23 : vector<16x1xf32>
    %25 = vector.broadcast %17 : vector<16x1xf32> to vector<16x32xf32>
    %26 = arith.subf %4, %25 : vector<16x32xf32>
    %cst_17 = arith.constant 9.99999974E-6 : f32
    %27 = vector.broadcast %cst_17 : f32 to vector<16x1xf32>
    %28 = arith.addf %24, %27 : vector<16x1xf32>
    %29 = math.rsqrt %28 : vector<16x1xf32>
    %30 = vector.broadcast %29 : vector<16x1xf32> to vector<16x32xf32>
    %31 = arith.mulf %26, %30 : vector<16x32xf32>
    %32 = vector.broadcast %6 : vector<1x32xf32> to vector<16x32xf32>
    %33 = arith.mulf %31, %32 : vector<16x32xf32>
    %34 = vector.broadcast %7 : vector<1x32xf32> to vector<16x32xf32>
    %35 = arith.addf %33, %34 : vector<16x32xf32>
    %c0_18 = arith.constant 0 : index
    %c0_19 = arith.constant 0 : index
    %36 = vector.load %arg3[%c0_18, %c0_19] : memref<360x64xf32, #tpu.memory_space<vmem>>, vector<32x32xf32>
    %cst_20 = arith.constant dense<0.000000e+00> : vector<16x32xf32>
    %37 = tpu.matmul %35, %36, %cst_20 {dimension_numbers = #tpu.dot_dimension_numbers<[1], [0], [0], [1], [0, 0, 1, 1], [], []>} : vector<16x32xf32>, vector<32x32xf32>, vector<16x32xf32> -> vector<16x32xf32>
    %38 = vector.broadcast %10 : vector<1x32xf32> to vector<16x32xf32>
    %39 = arith.addf %37, %38 : vector<16x32xf32>
    %40 = tpu.transpose %39, [1, 0] : vector<16x32xf32> -> vector<32x16xf32>
    %c32 = arith.constant 32 : index
    %c0_21 = arith.constant 0 : index
    %41 = vector.load %arg4[%c32, %c0_21] : memref<72x64xf32, #tpu.memory_space<vmem>>, vector<1x8xf32>
    %c36 = arith.constant 36 : index
    %c0_22 = arith.constant 0 : index
    %42 = vector.load %arg4[%c36, %c0_22] : memref<72x64xf32, #tpu.memory_space<vmem>>, vector<1x8xf32>
    %c0_23 = arith.constant 0 : index
    %c0_24 = arith.constant 0 : index
    %c0_25 = arith.constant 0 : index
    %c0_26 = arith.constant 0 : index
    %43 = vector.load %arg2[%c0_23, %c0_24, %c0_25, %c0_26] : memref<2x8x32x8xf32, #tpu.memory_space<vmem>>, vector<1x1x32x8xf32>
    %44 = vector.shape_cast %43 : vector<1x1x32x8xf32> to vector<32x8xf32>
    %cst_27 = arith.constant dense<0.000000e+00> : vector<16x8xf32>
    %45 = tpu.matmul %35, %44, %cst_27 {dimension_numbers = #tpu.dot_dimension_numbers<[1], [0], [0], [1], [0, 0, 1, 1], [], []>} : vector<16x32xf32>, vector<32x8xf32>, vector<16x8xf32> -> vector<16x8xf32>
    %46 = vector.broadcast %41 : vector<1x8xf32> to vector<16x8xf32>
    %47 = arith.addf %45, %46 : vector<16x8xf32>
    %c0_28 = arith.constant 0 : index
    %c4 = arith.constant 4 : index
    %c0_29 = arith.constant 0 : index
    %c0_30 = arith.constant 0 : index
    %48 = vector.load %arg2[%c0_28, %c4, %c0_29, %c0_30] : memref<2x8x32x8xf32, #tpu.memory_space<vmem>>, vector<1x1x32x8xf32>
    %49 = vector.shape_cast %48 : vector<1x1x32x8xf32> to vector<32x8xf32>
    %cst_31 = arith.constant dense<0.000000e+00> : vector<16x8xf32>
    %50 = tpu.matmul %35, %49, %cst_31 {dimension_numbers = #tpu.dot_dimension_numbers<[1], [0], [0], [1], [0, 0, 1, 1], [], []>} : vector<16x32xf32>, vector<32x8xf32>, vector<16x8xf32> -> vector<16x8xf32>
    %51 = vector.broadcast %42 : vector<1x8xf32> to vector<16x8xf32>
    %52 = arith.addf %50, %51 : vector<16x8xf32>
    %53 = vector.extract_strided_slice %40 {offsets = [0, 0], sizes = [8, 16], strides = [1, 1]} : vector<32x16xf32> to vector<8x16xf32>
    %cst_32 = arith.constant dense<0.000000e+00> : vector<16x16xf32>
    %54 = tpu.matmul %47, %53, %cst_32 {dimension_numbers = #tpu.dot_dimension_numbers<[1], [0], [0], [1], [0, 0, 1, 1], [], []>} : vector<16x8xf32>, vector<8x16xf32>, vector<16x16xf32> -> vector<16x16xf32>
    %55 = arith.addf %54, %5 : vector<16x16xf32>
    %cst_33 = arith.constant dense<0xFF800000> : vector<16xf32>
    %56 = vector.multi_reduction <maximumf>, %55, %cst_33 [1] : vector<16x16xf32> to vector<16xf32>
    %57 = vector.shape_cast %56 : vector<16xf32> to vector<16x1xf32>
    %58 = vector.broadcast %57 : vector<16x1xf32> to vector<16x16xf32>
    %59 = arith.subf %55, %58 : vector<16x16xf32>
    %60 = math.exp %59 : vector<16x16xf32>
    %cst_34 = arith.constant dense<0.000000e+00> : vector<16xf32>
    %61 = vector.multi_reduction <add>, %60, %cst_34 [1] : vector<16x16xf32> to vector<16xf32>
    %62 = vector.shape_cast %61 : vector<16xf32> to vector<16x1xf32>
    %63 = tpu.reciprocal %62 : vector<16x1xf32> -> vector<16x1xf32>
    %64 = vector.broadcast %63 : vector<16x1xf32> to vector<16x16xf32>
    %65 = arith.mulf %60, %64 : vector<16x16xf32>
    %cst_35 = arith.constant dense<0.000000e+00> : vector<16x8xf32>
    %66 = tpu.matmul %65, %52, %cst_35 {dimension_numbers = #tpu.dot_dimension_numbers<[1], [0], [0], [1], [0, 0, 1, 1], [], []>} : vector<16x16xf32>, vector<16x8xf32>, vector<16x8xf32> -> vector<16x8xf32>
    %c33 = arith.constant 33 : index
    %c0_36 = arith.constant 0 : index
    %67 = vector.load %arg4[%c33, %c0_36] : memref<72x64xf32, #tpu.memory_space<vmem>>, vector<1x8xf32>
    %c37 = arith.constant 37 : index
    %c0_37 = arith.constant 0 : index
    %68 = vector.load %arg4[%c37, %c0_37] : memref<72x64xf32, #tpu.memory_space<vmem>>, vector<1x8xf32>
    %c0_38 = arith.constant 0 : index
    %c1 = arith.constant 1 : index
    %c0_39 = arith.constant 0 : index
    %c0_40 = arith.constant 0 : index
    %69 = vector.load %arg2[%c0_38, %c1, %c0_39, %c0_40] : memref<2x8x32x8xf32, #tpu.memory_space<vmem>>, vector<1x1x32x8xf32>
    %70 = vector.shape_cast %69 : vector<1x1x32x8xf32> to vector<32x8xf32>
    %cst_41 = arith.constant dense<0.000000e+00> : vector<16x8xf32>
    %71 = tpu.matmul %35, %70, %cst_41 {dimension_numbers = #tpu.dot_dimension_numbers<[1], [0], [0], [1], [0, 0, 1, 1], [], []>} : vector<16x32xf32>, vector<32x8xf32>, vector<16x8xf32> -> vector<16x8xf32>
    %72 = vector.broadcast %67 : vector<1x8xf32> to vector<16x8xf32>
    %73 = arith.addf %71, %72 : vector<16x8xf32>
    %c0_42 = arith.constant 0 : index
    %c5 = arith.constant 5 : index
    %c0_43 = arith.constant 0 : index
    %c0_44 = arith.constant 0 : index
    %74 = vector.load %arg2[%c0_42, %c5, %c0_43, %c0_44] : memref<2x8x32x8xf32, #tpu.memory_space<vmem>>, vector<1x1x32x8xf32>
    %75 = vector.shape_cast %74 : vector<1x1x32x8xf32> to vector<32x8xf32>
    %cst_45 = arith.constant dense<0.000000e+00> : vector<16x8xf32>
    %76 = tpu.matmul %35, %75, %cst_45 {dimension_numbers = #tpu.dot_dimension_numbers<[1], [0], [0], [1], [0, 0, 1, 1], [], []>} : vector<16x32xf32>, vector<32x8xf32>, vector<16x8xf32> -> vector<16x8xf32>
    %77 = vector.broadcast %68 : vector<1x8xf32> to vector<16x8xf32>
    %78 = arith.addf %76, %77 : vector<16x8xf32>
    %79 = vector.extract_strided_slice %40 {offsets = [8, 0], sizes = [8, 16], strides = [1, 1]} : vector<32x16xf32> to vector<8x16xf32>
    %cst_46 = arith.constant dense<0.000000e+00> : vector<16x16xf32>
    %80 = tpu.matmul %73, %79, %cst_46 {dimension_numbers = #tpu.dot_dimension_numbers<[1], [0], [0], [1], [0, 0, 1, 1], [], []>} : vector<16x8xf32>, vector<8x16xf32>, vector<16x16xf32> -> vector<16x16xf32>
    %81 = arith.addf %80, %5 : vector<16x16xf32>
    %cst_47 = arith.constant dense<0xFF800000> : vector<16xf32>
    %82 = vector.multi_reduction <maximumf>, %81, %cst_47 [1] : vector<16x16xf32> to vector<16xf32>
    %83 = vector.shape_cast %82 : vector<16xf32> to vector<16x1xf32>
    %84 = vector.broadcast %83 : vector<16x1xf32> to vector<16x16xf32>
    %85 = arith.subf %81, %84 : vector<16x16xf32>
    %86 = math.exp %85 : vector<16x16xf32>
    %cst_48 = arith.constant dense<0.000000e+00> : vector<16xf32>
    %87 = vector.multi_reduction <add>, %86, %cst_48 [1] : vector<16x16xf32> to vector<16xf32>
    %88 = vector.shape_cast %87 : vector<16xf32> to vector<16x1xf32>
    %89 = tpu.reciprocal %88 : vector<16x1xf32> -> vector<16x1xf32>
    %90 = vector.broadcast %89 : vector<16x1xf32> to vector<16x16xf32>
    %91 = arith.mulf %86, %90 : vector<16x16xf32>
    %cst_49 = arith.constant dense<0.000000e+00> : vector<16x8xf32>
    %92 = tpu.matmul %91, %78, %cst_49 {dimension_numbers = #tpu.dot_dimension_numbers<[1], [0], [0], [1], [0, 0, 1, 1], [], []>} : vector<16x16xf32>, vector<16x8xf32>, vector<16x8xf32> -> vector<16x8xf32>
    %c34 = arith.constant 34 : index
    %c0_50 = arith.constant 0 : index
    %93 = vector.load %arg4[%c34, %c0_50] : memref<72x64xf32, #tpu.memory_space<vmem>>, vector<1x8xf32>
    %c38 = arith.constant 38 : index
    %c0_51 = arith.constant 0 : index
    %94 = vector.load %arg4[%c38, %c0_51] : memref<72x64xf32, #tpu.memory_space<vmem>>, vector<1x8xf32>
    %c0_52 = arith.constant 0 : index
    %c2 = arith.constant 2 : index
    %c0_53 = arith.constant 0 : index
    %c0_54 = arith.constant 0 : index
    %95 = vector.load %arg2[%c0_52, %c2, %c0_53, %c0_54] : memref<2x8x32x8xf32, #tpu.memory_space<vmem>>, vector<1x1x32x8xf32>
    %96 = vector.shape_cast %95 : vector<1x1x32x8xf32> to vector<32x8xf32>
    %cst_55 = arith.constant dense<0.000000e+00> : vector<16x8xf32>
    %97 = tpu.matmul %35, %96, %cst_55 {dimension_numbers = #tpu.dot_dimension_numbers<[1], [0], [0], [1], [0, 0, 1, 1], [], []>} : vector<16x32xf32>, vector<32x8xf32>, vector<16x8xf32> -> vector<16x8xf32>
    %98 = vector.broadcast %93 : vector<1x8xf32> to vector<16x8xf32>
    %99 = arith.addf %97, %98 : vector<16x8xf32>
    %c0_56 = arith.constant 0 : index
    %c6 = arith.constant 6 : index
    %c0_57 = arith.constant 0 : index
    %c0_58 = arith.constant 0 : index
    %100 = vector.load %arg2[%c0_56, %c6, %c0_57, %c0_58] : memref<2x8x32x8xf32, #tpu.memory_space<vmem>>, vector<1x1x32x8xf32>
    %101 = vector.shape_cast %100 : vector<1x1x32x8xf32> to vector<32x8xf32>
    %cst_59 = arith.constant dense<0.000000e+00> : vector<16x8xf32>
    %102 = tpu.matmul %35, %101, %cst_59 {dimension_numbers = #tpu.dot_dimension_numbers<[1], [0], [0], [1], [0, 0, 1, 1], [], []>} : vector<16x32xf32>, vector<32x8xf32>, vector<16x8xf32> -> vector<16x8xf32>
    %103 = vector.broadcast %94 : vector<1x8xf32> to vector<16x8xf32>
    %104 = arith.addf %102, %103 : vector<16x8xf32>
    %105 = vector.extract_strided_slice %40 {offsets = [16, 0], sizes = [8, 16], strides = [1, 1]} : vector<32x16xf32> to vector<8x16xf32>
    %cst_60 = arith.constant dense<0.000000e+00> : vector<16x16xf32>
    %106 = tpu.matmul %99, %105, %cst_60 {dimension_numbers = #tpu.dot_dimension_numbers<[1], [0], [0], [1], [0, 0, 1, 1], [], []>} : vector<16x8xf32>, vector<8x16xf32>, vector<16x16xf32> -> vector<16x16xf32>
    %107 = arith.addf %106, %5 : vector<16x16xf32>
    %cst_61 = arith.constant dense<0xFF800000> : vector<16xf32>
    %108 = vector.multi_reduction <maximumf>, %107, %cst_61 [1] : vector<16x16xf32> to vector<16xf32>
    %109 = vector.shape_cast %108 : vector<16xf32> to vector<16x1xf32>
    %110 = vector.broadcast %109 : vector<16x1xf32> to vector<16x16xf32>
    %111 = arith.subf %107, %110 : vector<16x16xf32>
    %112 = math.exp %111 : vector<16x16xf32>
    %cst_62 = arith.constant dense<0.000000e+00> : vector<16xf32>
    %113 = vector.multi_reduction <add>, %112, %cst_62 [1] : vector<16x16xf32> to vector<16xf32>
    %114 = vector.shape_cast %113 : vector<16xf32> to vector<16x1xf32>
    %115 = tpu.reciprocal %114 : vector<16x1xf32> -> vector<16x1xf32>
    %116 = vector.broadcast %115 : vector<16x1xf32> to vector<16x16xf32>
    %117 = arith.mulf %112, %116 : vector<16x16xf32>
    %cst_63 = arith.constant dense<0.000000e+00> : vector<16x8xf32>
    %118 = tpu.matmul %117, %104, %cst_63 {dimension_numbers = #tpu.dot_dimension_numbers<[1], [0], [0], [1], [0, 0, 1, 1], [], []>} : vector<16x16xf32>, vector<16x8xf32>, vector<16x8xf32> -> vector<16x8xf32>
    %c35 = arith.constant 35 : index
    %c0_64 = arith.constant 0 : index
    %119 = vector.load %arg4[%c35, %c0_64] : memref<72x64xf32, #tpu.memory_space<vmem>>, vector<1x8xf32>
    %c39 = arith.constant 39 : index
    %c0_65 = arith.constant 0 : index
    %120 = vector.load %arg4[%c39, %c0_65] : memref<72x64xf32, #tpu.memory_space<vmem>>, vector<1x8xf32>
    %c0_66 = arith.constant 0 : index
    %c3 = arith.constant 3 : index
    %c0_67 = arith.constant 0 : index
    %c0_68 = arith.constant 0 : index
    %121 = vector.load %arg2[%c0_66, %c3, %c0_67, %c0_68] : memref<2x8x32x8xf32, #tpu.memory_space<vmem>>, vector<1x1x32x8xf32>
    %122 = vector.shape_cast %121 : vector<1x1x32x8xf32> to vector<32x8xf32>
    %cst_69 = arith.constant dense<0.000000e+00> : vector<16x8xf32>
    %123 = tpu.matmul %35, %122, %cst_69 {dimension_numbers = #tpu.dot_dimension_numbers<[1], [0], [0], [1], [0, 0, 1, 1], [], []>} : vector<16x32xf32>, vector<32x8xf32>, vector<16x8xf32> -> vector<16x8xf32>
    %124 = vector.broadcast %119 : vector<1x8xf32> to vector<16x8xf32>
    %125 = arith.addf %123, %124 : vector<16x8xf32>
    %c0_70 = arith.constant 0 : index
    %c7 = arith.constant 7 : index
    %c0_71 = arith.constant 0 : index
    %c0_72 = arith.constant 0 : index
    %126 = vector.load %arg2[%c0_70, %c7, %c0_71, %c0_72] : memref<2x8x32x8xf32, #tpu.memory_space<vmem>>, vector<1x1x32x8xf32>
    %127 = vector.shape_cast %126 : vector<1x1x32x8xf32> to vector<32x8xf32>
    %cst_73 = arith.constant dense<0.000000e+00> : vector<16x8xf32>
    %128 = tpu.matmul %35, %127, %cst_73 {dimension_numbers = #tpu.dot_dimension_numbers<[1], [0], [0], [1], [0, 0, 1, 1], [], []>} : vector<16x32xf32>, vector<32x8xf32>, vector<16x8xf32> -> vector<16x8xf32>
    %129 = vector.broadcast %120 : vector<1x8xf32> to vector<16x8xf32>
    %130 = arith.addf %128, %129 : vector<16x8xf32>
    %131 = vector.extract_strided_slice %40 {offsets = [24, 0], sizes = [8, 16], strides = [1, 1]} : vector<32x16xf32> to vector<8x16xf32>
    %cst_74 = arith.constant dense<0.000000e+00> : vector<16x16xf32>
    %132 = tpu.matmul %125, %131, %cst_74 {dimension_numbers = #tpu.dot_dimension_numbers<[1], [0], [0], [1], [0, 0, 1, 1], [], []>} : vector<16x8xf32>, vector<8x16xf32>, vector<16x16xf32> -> vector<16x16xf32>
    %133 = arith.addf %132, %5 : vector<16x16xf32>
    %cst_75 = arith.constant dense<0xFF800000> : vector<16xf32>
    %134 = vector.multi_reduction <maximumf>, %133, %cst_75 [1] : vector<16x16xf32> to vector<16xf32>
    %135 = vector.shape_cast %134 : vector<16xf32> to vector<16x1xf32>
    %136 = vector.broadcast %135 : vector<16x1xf32> to vector<16x16xf32>
    %137 = arith.subf %133, %136 : vector<16x16xf32>
    %138 = math.exp %137 : vector<16x16xf32>
    %cst_76 = arith.constant dense<0.000000e+00> : vector<16xf32>
    %139 = vector.multi_reduction <add>, %138, %cst_76 [1] : vector<16x16xf32> to vector<16xf32>
    %140 = vector.shape_cast %139 : vector<16xf32> to vector<16x1xf32>
    %141 = tpu.reciprocal %140 : vector<16x1xf32> -> vector<16x1xf32>
    %142 = vector.broadcast %141 : vector<16x1xf32> to vector<16x16xf32>
    %143 = arith.mulf %138, %142 : vector<16x16xf32>
    %cst_77 = arith.constant dense<0.000000e+00> : vector<16x8xf32>
    %144 = tpu.matmul %143, %130, %cst_77 {dimension_numbers = #tpu.dot_dimension_numbers<[1], [0], [0], [1], [0, 0, 1, 1], [], []>} : vector<16x16xf32>, vector<16x8xf32>, vector<16x8xf32> -> vector<16x8xf32>
    %c32_78 = arith.constant 32 : index
    %c0_79 = arith.constant 0 : index
    %145 = vector.load %arg3[%c32_78, %c0_79] : memref<360x64xf32, #tpu.memory_space<vmem>>, vector<32x32xf32>
    %146 = vector.extract_strided_slice %145 {offsets = [0, 0], sizes = [8, 32], strides = [1, 1]} : vector<32x32xf32> to vector<8x32xf32>
    %cst_80 = arith.constant dense<0.000000e+00> : vector<16x32xf32>
    %147 = tpu.matmul %66, %146, %cst_80 {dimension_numbers = #tpu.dot_dimension_numbers<[1], [0], [0], [1], [0, 0, 1, 1], [], []>} : vector<16x8xf32>, vector<8x32xf32>, vector<16x32xf32> -> vector<16x32xf32>
    %148 = vector.extract_strided_slice %145 {offsets = [8, 0], sizes = [8, 32], strides = [1, 1]} : vector<32x32xf32> to vector<8x32xf32>
    %cst_81 = arith.constant dense<0.000000e+00> : vector<16x32xf32>
    %149 = tpu.matmul %92, %148, %cst_81 {dimension_numbers = #tpu.dot_dimension_numbers<[1], [0], [0], [1], [0, 0, 1, 1], [], []>} : vector<16x8xf32>, vector<8x32xf32>, vector<16x32xf32> -> vector<16x32xf32>
    %150 = arith.addf %147, %149 : vector<16x32xf32>
    %151 = vector.extract_strided_slice %145 {offsets = [16, 0], sizes = [8, 32], strides = [1, 1]} : vector<32x32xf32> to vector<8x32xf32>
    %cst_82 = arith.constant dense<0.000000e+00> : vector<16x32xf32>
    %152 = tpu.matmul %118, %151, %cst_82 {dimension_numbers = #tpu.dot_dimension_numbers<[1], [0], [0], [1], [0, 0, 1, 1], [], []>} : vector<16x8xf32>, vector<8x32xf32>, vector<16x32xf32> -> vector<16x32xf32>
    %153 = arith.addf %150, %152 : vector<16x32xf32>
    %154 = vector.extract_strided_slice %145 {offsets = [24, 0], sizes = [8, 32], strides = [1, 1]} : vector<32x32xf32> to vector<8x32xf32>
    %cst_83 = arith.constant dense<0.000000e+00> : vector<16x32xf32>
    %155 = tpu.matmul %144, %154, %cst_83 {dimension_numbers = #tpu.dot_dimension_numbers<[1], [0], [0], [1], [0, 0, 1, 1], [], []>} : vector<16x8xf32>, vector<8x32xf32>, vector<16x32xf32> -> vector<16x32xf32>
    %156 = arith.addf %153, %155 : vector<16x32xf32>
    %157 = arith.addf %4, %156 : vector<16x32xf32>
    %158 = vector.broadcast %11 : vector<1x32xf32> to vector<16x32xf32>
    %159 = arith.addf %157, %158 : vector<16x32xf32>
    %cst_84 = arith.constant dense<0.000000e+00> : vector<16xf32>
    %160 = vector.multi_reduction <add>, %159, %cst_84 [1] : vector<16x32xf32> to vector<16xf32>
    %161 = vector.shape_cast %160 : vector<16xf32> to vector<16x1xf32>
    %cst_85 = arith.constant 3.200000e+01 : f32
    %162 = vector.broadcast %cst_85 : f32 to vector<16x1xf32>
    %163 = arith.divf %161, %162 : vector<16x1xf32>
    %164 = vector.broadcast %163 : vector<16x1xf32> to vector<16x32xf32>
    %165 = arith.subf %159, %164 : vector<16x32xf32>
    %166 = arith.mulf %165, %165 : vector<16x32xf32>
    %cst_86 = arith.constant dense<0.000000e+00> : vector<16xf32>
    %167 = vector.multi_reduction <add>, %166, %cst_86 [1] : vector<16x32xf32> to vector<16xf32>
    %168 = vector.shape_cast %167 : vector<16xf32> to vector<16x1xf32>
    %cst_87 = arith.constant 3.200000e+01 : f32
    %169 = vector.broadcast %cst_87 : f32 to vector<16x1xf32>
    %170 = arith.divf %168, %169 : vector<16x1xf32>
    %171 = vector.broadcast %163 : vector<16x1xf32> to vector<16x32xf32>
    %172 = arith.subf %159, %171 : vector<16x32xf32>
    %cst_88 = arith.constant 9.99999974E-6 : f32
    %173 = vector.broadcast %cst_88 : f32 to vector<16x1xf32>
    %174 = arith.addf %170, %173 : vector<16x1xf32>
    %175 = math.rsqrt %174 : vector<16x1xf32>
    %176 = vector.broadcast %175 : vector<16x1xf32> to vector<16x32xf32>
    %177 = arith.mulf %172, %176 : vector<16x32xf32>
    %178 = vector.broadcast %8 : vector<1x32xf32> to vector<16x32xf32>
    %179 = arith.mulf %177, %178 : vector<16x32xf32>
    %180 = vector.broadcast %9 : vector<1x32xf32> to vector<16x32xf32>
    %181 = arith.addf %179, %180 : vector<16x32xf32>
    %c64 = arith.constant 64 : index
    %c0_89 = arith.constant 0 : index
    %182 = vector.load %arg3[%c64, %c0_89] : memref<360x64xf32, #tpu.memory_space<vmem>>, vector<32x64xf32>
    %c96 = arith.constant 96 : index
    %c0_90 = arith.constant 0 : index
    %183 = vector.load %arg3[%c96, %c0_90] : memref<360x64xf32, #tpu.memory_space<vmem>>, vector<64x32xf32>
    %cst_91 = arith.constant dense<0.000000e+00> : vector<16x64xf32>
    %184 = tpu.matmul %181, %182, %cst_91 {dimension_numbers = #tpu.dot_dimension_numbers<[1], [0], [0], [1], [0, 0, 1, 1], [], []>} : vector<16x32xf32>, vector<32x64xf32>, vector<16x64xf32> -> vector<16x64xf32>
    %185 = vector.broadcast %12 : vector<1x64xf32> to vector<16x64xf32>
    %186 = arith.addf %184, %185 : vector<16x64xf32>
    %cst_92 = arith.constant 5.000000e-01 : f32
    %187 = vector.broadcast %cst_92 : f32 to vector<16x64xf32>
    %188 = arith.mulf %187, %186 : vector<16x64xf32>
    %cst_93 = arith.constant 0.707106769 : f32
    %189 = vector.broadcast %cst_93 : f32 to vector<16x64xf32>
    %190 = arith.mulf %186, %189 : vector<16x64xf32>
    %191 = math.erf %190 : vector<16x64xf32>
    %cst_94 = arith.constant 1.000000e+00 : f32
    %192 = vector.broadcast %cst_94 : f32 to vector<16x64xf32>
    %193 = arith.addf %192, %191 : vector<16x64xf32>
    %194 = arith.mulf %188, %193 : vector<16x64xf32>
    %cst_95 = arith.constant dense<0.000000e+00> : vector<16x32xf32>
    %195 = tpu.matmul %194, %183, %cst_95 {dimension_numbers = #tpu.dot_dimension_numbers<[1], [0], [0], [1], [0, 0, 1, 1], [], []>} : vector<16x64xf32>, vector<64x32xf32>, vector<16x32xf32> -> vector<16x32xf32>
    %196 = vector.broadcast %13 : vector<1x32xf32> to vector<16x32xf32>
    %197 = arith.addf %195, %196 : vector<16x32xf32>
    %198 = arith.addf %159, %197 : vector<16x32xf32>
    %c40 = arith.constant 40 : index
    %c0_96 = arith.constant 0 : index
    %199 = vector.load %arg4[%c40, %c0_96] : memref<72x64xf32, #tpu.memory_space<vmem>>, vector<1x32xf32>
    %c41 = arith.constant 41 : index
    %c0_97 = arith.constant 0 : index
    %200 = vector.load %arg4[%c41, %c0_97] : memref<72x64xf32, #tpu.memory_space<vmem>>, vector<1x32xf32>
    %c42 = arith.constant 42 : index
    %c0_98 = arith.constant 0 : index
    %201 = vector.load %arg4[%c42, %c0_98] : memref<72x64xf32, #tpu.memory_space<vmem>>, vector<1x32xf32>
    %c43 = arith.constant 43 : index
    %c0_99 = arith.constant 0 : index
    %202 = vector.load %arg4[%c43, %c0_99] : memref<72x64xf32, #tpu.memory_space<vmem>>, vector<1x32xf32>
    %c44 = arith.constant 44 : index
    %c0_100 = arith.constant 0 : index
    %203 = vector.load %arg4[%c44, %c0_100] : memref<72x64xf32, #tpu.memory_space<vmem>>, vector<1x32xf32>
    %c45 = arith.constant 45 : index
    %c0_101 = arith.constant 0 : index
    %204 = vector.load %arg4[%c45, %c0_101] : memref<72x64xf32, #tpu.memory_space<vmem>>, vector<1x32xf32>
    %c46 = arith.constant 46 : index
    %c0_102 = arith.constant 0 : index
    %205 = vector.load %arg4[%c46, %c0_102] : memref<72x64xf32, #tpu.memory_space<vmem>>, vector<1x64xf32>
    %c47 = arith.constant 47 : index
    %c0_103 = arith.constant 0 : index
    %206 = vector.load %arg4[%c47, %c0_103] : memref<72x64xf32, #tpu.memory_space<vmem>>, vector<1x32xf32>
    %cst_104 = arith.constant dense<0.000000e+00> : vector<16xf32>
    %207 = vector.multi_reduction <add>, %198, %cst_104 [1] : vector<16x32xf32> to vector<16xf32>
    %208 = vector.shape_cast %207 : vector<16xf32> to vector<16x1xf32>
    %cst_105 = arith.constant 3.200000e+01 : f32
    %209 = vector.broadcast %cst_105 : f32 to vector<16x1xf32>
    %210 = arith.divf %208, %209 : vector<16x1xf32>
    %211 = vector.broadcast %210 : vector<16x1xf32> to vector<16x32xf32>
    %212 = arith.subf %198, %211 : vector<16x32xf32>
    %213 = arith.mulf %212, %212 : vector<16x32xf32>
    %cst_106 = arith.constant dense<0.000000e+00> : vector<16xf32>
    %214 = vector.multi_reduction <add>, %213, %cst_106 [1] : vector<16x32xf32> to vector<16xf32>
    %215 = vector.shape_cast %214 : vector<16xf32> to vector<16x1xf32>
    %cst_107 = arith.constant 3.200000e+01 : f32
    %216 = vector.broadcast %cst_107 : f32 to vector<16x1xf32>
    %217 = arith.divf %215, %216 : vector<16x1xf32>
    %218 = vector.broadcast %210 : vector<16x1xf32> to vector<16x32xf32>
    %219 = arith.subf %198, %218 : vector<16x32xf32>
    %cst_108 = arith.constant 9.99999974E-6 : f32
    %220 = vector.broadcast %cst_108 : f32 to vector<16x1xf32>
    %221 = arith.addf %217, %220 : vector<16x1xf32>
    %222 = math.rsqrt %221 : vector<16x1xf32>
    %223 = vector.broadcast %222 : vector<16x1xf32> to vector<16x32xf32>
    %224 = arith.mulf %219, %223 : vector<16x32xf32>
    %225 = vector.broadcast %199 : vector<1x32xf32> to vector<16x32xf32>
    %226 = arith.mulf %224, %225 : vector<16x32xf32>
    %227 = vector.broadcast %200 : vector<1x32xf32> to vector<16x32xf32>
    %228 = arith.addf %226, %227 : vector<16x32xf32>
    %c160 = arith.constant 160 : index
    %c0_109 = arith.constant 0 : index
    %229 = vector.load %arg3[%c160, %c0_109] : memref<360x64xf32, #tpu.memory_space<vmem>>, vector<32x32xf32>
    %cst_110 = arith.constant dense<0.000000e+00> : vector<16x32xf32>
    %230 = tpu.matmul %228, %229, %cst_110 {dimension_numbers = #tpu.dot_dimension_numbers<[1], [0], [0], [1], [0, 0, 1, 1], [], []>} : vector<16x32xf32>, vector<32x32xf32>, vector<16x32xf32> -> vector<16x32xf32>
    %231 = vector.broadcast %203 : vector<1x32xf32> to vector<16x32xf32>
    %232 = arith.addf %230, %231 : vector<16x32xf32>
    %233 = tpu.transpose %232, [1, 0] : vector<16x32xf32> -> vector<32x16xf32>
    %c48 = arith.constant 48 : index
    %c0_111 = arith.constant 0 : index
    %234 = vector.load %arg4[%c48, %c0_111] : memref<72x64xf32, #tpu.memory_space<vmem>>, vector<1x8xf32>
    %c52 = arith.constant 52 : index
    %c0_112 = arith.constant 0 : index
    %235 = vector.load %arg4[%c52, %c0_112] : memref<72x64xf32, #tpu.memory_space<vmem>>, vector<1x8xf32>
    %c1_113 = arith.constant 1 : index
    %c0_114 = arith.constant 0 : index
    %c0_115 = arith.constant 0 : index
    %c0_116 = arith.constant 0 : index
    %236 = vector.load %arg2[%c1_113, %c0_114, %c0_115, %c0_116] : memref<2x8x32x8xf32, #tpu.memory_space<vmem>>, vector<1x1x32x8xf32>
    %237 = vector.shape_cast %236 : vector<1x1x32x8xf32> to vector<32x8xf32>
    %cst_117 = arith.constant dense<0.000000e+00> : vector<16x8xf32>
    %238 = tpu.matmul %228, %237, %cst_117 {dimension_numbers = #tpu.dot_dimension_numbers<[1], [0], [0], [1], [0, 0, 1, 1], [], []>} : vector<16x32xf32>, vector<32x8xf32>, vector<16x8xf32> -> vector<16x8xf32>
    %239 = vector.broadcast %234 : vector<1x8xf32> to vector<16x8xf32>
    %240 = arith.addf %238, %239 : vector<16x8xf32>
    %c1_118 = arith.constant 1 : index
    %c4_119 = arith.constant 4 : index
    %c0_120 = arith.constant 0 : index
    %c0_121 = arith.constant 0 : index
    %241 = vector.load %arg2[%c1_118, %c4_119, %c0_120, %c0_121] : memref<2x8x32x8xf32, #tpu.memory_space<vmem>>, vector<1x1x32x8xf32>
    %242 = vector.shape_cast %241 : vector<1x1x32x8xf32> to vector<32x8xf32>
    %cst_122 = arith.constant dense<0.000000e+00> : vector<16x8xf32>
    %243 = tpu.matmul %228, %242, %cst_122 {dimension_numbers = #tpu.dot_dimension_numbers<[1], [0], [0], [1], [0, 0, 1, 1], [], []>} : vector<16x32xf32>, vector<32x8xf32>, vector<16x8xf32> -> vector<16x8xf32>
    %244 = vector.broadcast %235 : vector<1x8xf32> to vector<16x8xf32>
    %245 = arith.addf %243, %244 : vector<16x8xf32>
    %246 = vector.extract_strided_slice %233 {offsets = [0, 0], sizes = [8, 16], strides = [1, 1]} : vector<32x16xf32> to vector<8x16xf32>
    %cst_123 = arith.constant dense<0.000000e+00> : vector<16x16xf32>
    %247 = tpu.matmul %240, %246, %cst_123 {dimension_numbers = #tpu.dot_dimension_numbers<[1], [0], [0], [1], [0, 0, 1, 1], [], []>} : vector<16x8xf32>, vector<8x16xf32>, vector<16x16xf32> -> vector<16x16xf32>
    %248 = arith.addf %247, %5 : vector<16x16xf32>
    %cst_124 = arith.constant dense<0xFF800000> : vector<16xf32>
    %249 = vector.multi_reduction <maximumf>, %248, %cst_124 [1] : vector<16x16xf32> to vector<16xf32>
    %250 = vector.shape_cast %249 : vector<16xf32> to vector<16x1xf32>
    %251 = vector.broadcast %250 : vector<16x1xf32> to vector<16x16xf32>
    %252 = arith.subf %248, %251 : vector<16x16xf32>
    %253 = math.exp %252 : vector<16x16xf32>
    %cst_125 = arith.constant dense<0.000000e+00> : vector<16xf32>
    %254 = vector.multi_reduction <add>, %253, %cst_125 [1] : vector<16x16xf32> to vector<16xf32>
    %255 = vector.shape_cast %254 : vector<16xf32> to vector<16x1xf32>
    %256 = tpu.reciprocal %255 : vector<16x1xf32> -> vector<16x1xf32>
    %257 = vector.broadcast %256 : vector<16x1xf32> to vector<16x16xf32>
    %258 = arith.mulf %253, %257 : vector<16x16xf32>
    %cst_126 = arith.constant dense<0.000000e+00> : vector<16x8xf32>
    %259 = tpu.matmul %258, %245, %cst_126 {dimension_numbers = #tpu.dot_dimension_numbers<[1], [0], [0], [1], [0, 0, 1, 1], [], []>} : vector<16x16xf32>, vector<16x8xf32>, vector<16x8xf32> -> vector<16x8xf32>
    %c49 = arith.constant 49 : index
    %c0_127 = arith.constant 0 : index
    %260 = vector.load %arg4[%c49, %c0_127] : memref<72x64xf32, #tpu.memory_space<vmem>>, vector<1x8xf32>
    %c53 = arith.constant 53 : index
    %c0_128 = arith.constant 0 : index
    %261 = vector.load %arg4[%c53, %c0_128] : memref<72x64xf32, #tpu.memory_space<vmem>>, vector<1x8xf32>
    %c1_129 = arith.constant 1 : index
    %c1_130 = arith.constant 1 : index
    %c0_131 = arith.constant 0 : index
    %c0_132 = arith.constant 0 : index
    %262 = vector.load %arg2[%c1_129, %c1_130, %c0_131, %c0_132] : memref<2x8x32x8xf32, #tpu.memory_space<vmem>>, vector<1x1x32x8xf32>
    %263 = vector.shape_cast %262 : vector<1x1x32x8xf32> to vector<32x8xf32>
    %cst_133 = arith.constant dense<0.000000e+00> : vector<16x8xf32>
    %264 = tpu.matmul %228, %263, %cst_133 {dimension_numbers = #tpu.dot_dimension_numbers<[1], [0], [0], [1], [0, 0, 1, 1], [], []>} : vector<16x32xf32>, vector<32x8xf32>, vector<16x8xf32> -> vector<16x8xf32>
    %265 = vector.broadcast %260 : vector<1x8xf32> to vector<16x8xf32>
    %266 = arith.addf %264, %265 : vector<16x8xf32>
    %c1_134 = arith.constant 1 : index
    %c5_135 = arith.constant 5 : index
    %c0_136 = arith.constant 0 : index
    %c0_137 = arith.constant 0 : index
    %267 = vector.load %arg2[%c1_134, %c5_135, %c0_136, %c0_137] : memref<2x8x32x8xf32, #tpu.memory_space<vmem>>, vector<1x1x32x8xf32>
    %268 = vector.shape_cast %267 : vector<1x1x32x8xf32> to vector<32x8xf32>
    %cst_138 = arith.constant dense<0.000000e+00> : vector<16x8xf32>
    %269 = tpu.matmul %228, %268, %cst_138 {dimension_numbers = #tpu.dot_dimension_numbers<[1], [0], [0], [1], [0, 0, 1, 1], [], []>} : vector<16x32xf32>, vector<32x8xf32>, vector<16x8xf32> -> vector<16x8xf32>
    %270 = vector.broadcast %261 : vector<1x8xf32> to vector<16x8xf32>
    %271 = arith.addf %269, %270 : vector<16x8xf32>
    %272 = vector.extract_strided_slice %233 {offsets = [8, 0], sizes = [8, 16], strides = [1, 1]} : vector<32x16xf32> to vector<8x16xf32>
    %cst_139 = arith.constant dense<0.000000e+00> : vector<16x16xf32>
    %273 = tpu.matmul %266, %272, %cst_139 {dimension_numbers = #tpu.dot_dimension_numbers<[1], [0], [0], [1], [0, 0, 1, 1], [], []>} : vector<16x8xf32>, vector<8x16xf32>, vector<16x16xf32> -> vector<16x16xf32>
    %274 = arith.addf %273, %5 : vector<16x16xf32>
    %cst_140 = arith.constant dense<0xFF800000> : vector<16xf32>
    %275 = vector.multi_reduction <maximumf>, %274, %cst_140 [1] : vector<16x16xf32> to vector<16xf32>
    %276 = vector.shape_cast %275 : vector<16xf32> to vector<16x1xf32>
    %277 = vector.broadcast %276 : vector<16x1xf32> to vector<16x16xf32>
    %278 = arith.subf %274, %277 : vector<16x16xf32>
    %279 = math.exp %278 : vector<16x16xf32>
    %cst_141 = arith.constant dense<0.000000e+00> : vector<16xf32>
    %280 = vector.multi_reduction <add>, %279, %cst_141 [1] : vector<16x16xf32> to vector<16xf32>
    %281 = vector.shape_cast %280 : vector<16xf32> to vector<16x1xf32>
    %282 = tpu.reciprocal %281 : vector<16x1xf32> -> vector<16x1xf32>
    %283 = vector.broadcast %282 : vector<16x1xf32> to vector<16x16xf32>
    %284 = arith.mulf %279, %283 : vector<16x16xf32>
    %cst_142 = arith.constant dense<0.000000e+00> : vector<16x8xf32>
    %285 = tpu.matmul %284, %271, %cst_142 {dimension_numbers = #tpu.dot_dimension_numbers<[1], [0], [0], [1], [0, 0, 1, 1], [], []>} : vector<16x16xf32>, vector<16x8xf32>, vector<16x8xf32> -> vector<16x8xf32>
    %c50 = arith.constant 50 : index
    %c0_143 = arith.constant 0 : index
    %286 = vector.load %arg4[%c50, %c0_143] : memref<72x64xf32, #tpu.memory_space<vmem>>, vector<1x8xf32>
    %c54 = arith.constant 54 : index
    %c0_144 = arith.constant 0 : index
    %287 = vector.load %arg4[%c54, %c0_144] : memref<72x64xf32, #tpu.memory_space<vmem>>, vector<1x8xf32>
    %c1_145 = arith.constant 1 : index
    %c2_146 = arith.constant 2 : index
    %c0_147 = arith.constant 0 : index
    %c0_148 = arith.constant 0 : index
    %288 = vector.load %arg2[%c1_145, %c2_146, %c0_147, %c0_148] : memref<2x8x32x8xf32, #tpu.memory_space<vmem>>, vector<1x1x32x8xf32>
    %289 = vector.shape_cast %288 : vector<1x1x32x8xf32> to vector<32x8xf32>
    %cst_149 = arith.constant dense<0.000000e+00> : vector<16x8xf32>
    %290 = tpu.matmul %228, %289, %cst_149 {dimension_numbers = #tpu.dot_dimension_numbers<[1], [0], [0], [1], [0, 0, 1, 1], [], []>} : vector<16x32xf32>, vector<32x8xf32>, vector<16x8xf32> -> vector<16x8xf32>
    %291 = vector.broadcast %286 : vector<1x8xf32> to vector<16x8xf32>
    %292 = arith.addf %290, %291 : vector<16x8xf32>
    %c1_150 = arith.constant 1 : index
    %c6_151 = arith.constant 6 : index
    %c0_152 = arith.constant 0 : index
    %c0_153 = arith.constant 0 : index
    %293 = vector.load %arg2[%c1_150, %c6_151, %c0_152, %c0_153] : memref<2x8x32x8xf32, #tpu.memory_space<vmem>>, vector<1x1x32x8xf32>
    %294 = vector.shape_cast %293 : vector<1x1x32x8xf32> to vector<32x8xf32>
    %cst_154 = arith.constant dense<0.000000e+00> : vector<16x8xf32>
    %295 = tpu.matmul %228, %294, %cst_154 {dimension_numbers = #tpu.dot_dimension_numbers<[1], [0], [0], [1], [0, 0, 1, 1], [], []>} : vector<16x32xf32>, vector<32x8xf32>, vector<16x8xf32> -> vector<16x8xf32>
    %296 = vector.broadcast %287 : vector<1x8xf32> to vector<16x8xf32>
    %297 = arith.addf %295, %296 : vector<16x8xf32>
    %298 = vector.extract_strided_slice %233 {offsets = [16, 0], sizes = [8, 16], strides = [1, 1]} : vector<32x16xf32> to vector<8x16xf32>
    %cst_155 = arith.constant dense<0.000000e+00> : vector<16x16xf32>
    %299 = tpu.matmul %292, %298, %cst_155 {dimension_numbers = #tpu.dot_dimension_numbers<[1], [0], [0], [1], [0, 0, 1, 1], [], []>} : vector<16x8xf32>, vector<8x16xf32>, vector<16x16xf32> -> vector<16x16xf32>
    %300 = arith.addf %299, %5 : vector<16x16xf32>
    %cst_156 = arith.constant dense<0xFF800000> : vector<16xf32>
    %301 = vector.multi_reduction <maximumf>, %300, %cst_156 [1] : vector<16x16xf32> to vector<16xf32>
    %302 = vector.shape_cast %301 : vector<16xf32> to vector<16x1xf32>
    %303 = vector.broadcast %302 : vector<16x1xf32> to vector<16x16xf32>
    %304 = arith.subf %300, %303 : vector<16x16xf32>
    %305 = math.exp %304 : vector<16x16xf32>
    %cst_157 = arith.constant dense<0.000000e+00> : vector<16xf32>
    %306 = vector.multi_reduction <add>, %305, %cst_157 [1] : vector<16x16xf32> to vector<16xf32>
    %307 = vector.shape_cast %306 : vector<16xf32> to vector<16x1xf32>
    %308 = tpu.reciprocal %307 : vector<16x1xf32> -> vector<16x1xf32>
    %309 = vector.broadcast %308 : vector<16x1xf32> to vector<16x16xf32>
    %310 = arith.mulf %305, %309 : vector<16x16xf32>
    %cst_158 = arith.constant dense<0.000000e+00> : vector<16x8xf32>
    %311 = tpu.matmul %310, %297, %cst_158 {dimension_numbers = #tpu.dot_dimension_numbers<[1], [0], [0], [1], [0, 0, 1, 1], [], []>} : vector<16x16xf32>, vector<16x8xf32>, vector<16x8xf32> -> vector<16x8xf32>
    %c51 = arith.constant 51 : index
    %c0_159 = arith.constant 0 : index
    %312 = vector.load %arg4[%c51, %c0_159] : memref<72x64xf32, #tpu.memory_space<vmem>>, vector<1x8xf32>
    %c55 = arith.constant 55 : index
    %c0_160 = arith.constant 0 : index
    %313 = vector.load %arg4[%c55, %c0_160] : memref<72x64xf32, #tpu.memory_space<vmem>>, vector<1x8xf32>
    %c1_161 = arith.constant 1 : index
    %c3_162 = arith.constant 3 : index
    %c0_163 = arith.constant 0 : index
    %c0_164 = arith.constant 0 : index
    %314 = vector.load %arg2[%c1_161, %c3_162, %c0_163, %c0_164] : memref<2x8x32x8xf32, #tpu.memory_space<vmem>>, vector<1x1x32x8xf32>
    %315 = vector.shape_cast %314 : vector<1x1x32x8xf32> to vector<32x8xf32>
    %cst_165 = arith.constant dense<0.000000e+00> : vector<16x8xf32>
    %316 = tpu.matmul %228, %315, %cst_165 {dimension_numbers = #tpu.dot_dimension_numbers<[1], [0], [0], [1], [0, 0, 1, 1], [], []>} : vector<16x32xf32>, vector<32x8xf32>, vector<16x8xf32> -> vector<16x8xf32>
    %317 = vector.broadcast %312 : vector<1x8xf32> to vector<16x8xf32>
    %318 = arith.addf %316, %317 : vector<16x8xf32>
    %c1_166 = arith.constant 1 : index
    %c7_167 = arith.constant 7 : index
    %c0_168 = arith.constant 0 : index
    %c0_169 = arith.constant 0 : index
    %319 = vector.load %arg2[%c1_166, %c7_167, %c0_168, %c0_169] : memref<2x8x32x8xf32, #tpu.memory_space<vmem>>, vector<1x1x32x8xf32>
    %320 = vector.shape_cast %319 : vector<1x1x32x8xf32> to vector<32x8xf32>
    %cst_170 = arith.constant dense<0.000000e+00> : vector<16x8xf32>
    %321 = tpu.matmul %228, %320, %cst_170 {dimension_numbers = #tpu.dot_dimension_numbers<[1], [0], [0], [1], [0, 0, 1, 1], [], []>} : vector<16x32xf32>, vector<32x8xf32>, vector<16x8xf32> -> vector<16x8xf32>
    %322 = vector.broadcast %313 : vector<1x8xf32> to vector<16x8xf32>
    %323 = arith.addf %321, %322 : vector<16x8xf32>
    %324 = vector.extract_strided_slice %233 {offsets = [24, 0], sizes = [8, 16], strides = [1, 1]} : vector<32x16xf32> to vector<8x16xf32>
    %cst_171 = arith.constant dense<0.000000e+00> : vector<16x16xf32>
    %325 = tpu.matmul %318, %324, %cst_171 {dimension_numbers = #tpu.dot_dimension_numbers<[1], [0], [0], [1], [0, 0, 1, 1], [], []>} : vector<16x8xf32>, vector<8x16xf32>, vector<16x16xf32> -> vector<16x16xf32>
    %326 = arith.addf %325, %5 : vector<16x16xf32>
    %cst_172 = arith.constant dense<0xFF800000> : vector<16xf32>
    %327 = vector.multi_reduction <maximumf>, %326, %cst_172 [1] : vector<16x16xf32> to vector<16xf32>
    %328 = vector.shape_cast %327 : vector<16xf32> to vector<16x1xf32>
    %329 = vector.broadcast %328 : vector<16x1xf32> to vector<16x16xf32>
    %330 = arith.subf %326, %329 : vector<16x16xf32>
    %331 = math.exp %330 : vector<16x16xf32>
    %cst_173 = arith.constant dense<0.000000e+00> : vector<16xf32>
    %332 = vector.multi_reduction <add>, %331, %cst_173 [1] : vector<16x16xf32> to vector<16xf32>
    %333 = vector.shape_cast %332 : vector<16xf32> to vector<16x1xf32>
    %334 = tpu.reciprocal %333 : vector<16x1xf32> -> vector<16x1xf32>
    %335 = vector.broadcast %334 : vector<16x1xf32> to vector<16x16xf32>
    %336 = arith.mulf %331, %335 : vector<16x16xf32>
    %cst_174 = arith.constant dense<0.000000e+00> : vector<16x8xf32>
    %337 = tpu.matmul %336, %323, %cst_174 {dimension_numbers = #tpu.dot_dimension_numbers<[1], [0], [0], [1], [0, 0, 1, 1], [], []>} : vector<16x16xf32>, vector<16x8xf32>, vector<16x8xf32> -> vector<16x8xf32>
    %c192 = arith.constant 192 : index
    %c0_175 = arith.constant 0 : index
    %338 = vector.load %arg3[%c192, %c0_175] : memref<360x64xf32, #tpu.memory_space<vmem>>, vector<32x32xf32>
    %339 = vector.extract_strided_slice %338 {offsets = [0, 0], sizes = [8, 32], strides = [1, 1]} : vector<32x32xf32> to vector<8x32xf32>
    %cst_176 = arith.constant dense<0.000000e+00> : vector<16x32xf32>
    %340 = tpu.matmul %259, %339, %cst_176 {dimension_numbers = #tpu.dot_dimension_numbers<[1], [0], [0], [1], [0, 0, 1, 1], [], []>} : vector<16x8xf32>, vector<8x32xf32>, vector<16x32xf32> -> vector<16x32xf32>
    %341 = vector.extract_strided_slice %338 {offsets = [8, 0], sizes = [8, 32], strides = [1, 1]} : vector<32x32xf32> to vector<8x32xf32>
    %cst_177 = arith.constant dense<0.000000e+00> : vector<16x32xf32>
    %342 = tpu.matmul %285, %341, %cst_177 {dimension_numbers = #tpu.dot_dimension_numbers<[1], [0], [0], [1], [0, 0, 1, 1], [], []>} : vector<16x8xf32>, vector<8x32xf32>, vector<16x32xf32> -> vector<16x32xf32>
    %343 = arith.addf %340, %342 : vector<16x32xf32>
    %344 = vector.extract_strided_slice %338 {offsets = [16, 0], sizes = [8, 32], strides = [1, 1]} : vector<32x32xf32> to vector<8x32xf32>
    %cst_178 = arith.constant dense<0.000000e+00> : vector<16x32xf32>
    %345 = tpu.matmul %311, %344, %cst_178 {dimension_numbers = #tpu.dot_dimension_numbers<[1], [0], [0], [1], [0, 0, 1, 1], [], []>} : vector<16x8xf32>, vector<8x32xf32>, vector<16x32xf32> -> vector<16x32xf32>
    %346 = arith.addf %343, %345 : vector<16x32xf32>
    %347 = vector.extract_strided_slice %338 {offsets = [24, 0], sizes = [8, 32], strides = [1, 1]} : vector<32x32xf32> to vector<8x32xf32>
    %cst_179 = arith.constant dense<0.000000e+00> : vector<16x32xf32>
    %348 = tpu.matmul %337, %347, %cst_179 {dimension_numbers = #tpu.dot_dimension_numbers<[1], [0], [0], [1], [0, 0, 1, 1], [], []>} : vector<16x8xf32>, vector<8x32xf32>, vector<16x32xf32> -> vector<16x32xf32>
    %349 = arith.addf %346, %348 : vector<16x32xf32>
    %350 = arith.addf %198, %349 : vector<16x32xf32>
    %351 = vector.broadcast %204 : vector<1x32xf32> to vector<16x32xf32>
    %352 = arith.addf %350, %351 : vector<16x32xf32>
    %cst_180 = arith.constant dense<0.000000e+00> : vector<16xf32>
    %353 = vector.multi_reduction <add>, %352, %cst_180 [1] : vector<16x32xf32> to vector<16xf32>
    %354 = vector.shape_cast %353 : vector<16xf32> to vector<16x1xf32>
    %cst_181 = arith.constant 3.200000e+01 : f32
    %355 = vector.broadcast %cst_181 : f32 to vector<16x1xf32>
    %356 = arith.divf %354, %355 : vector<16x1xf32>
    %357 = vector.broadcast %356 : vector<16x1xf32> to vector<16x32xf32>
    %358 = arith.subf %352, %357 : vector<16x32xf32>
    %359 = arith.mulf %358, %358 : vector<16x32xf32>
    %cst_182 = arith.constant dense<0.000000e+00> : vector<16xf32>
    %360 = vector.multi_reduction <add>, %359, %cst_182 [1] : vector<16x32xf32> to vector<16xf32>
    %361 = vector.shape_cast %360 : vector<16xf32> to vector<16x1xf32>
    %cst_183 = arith.constant 3.200000e+01 : f32
    %362 = vector.broadcast %cst_183 : f32 to vector<16x1xf32>
    %363 = arith.divf %361, %362 : vector<16x1xf32>
    %364 = vector.broadcast %356 : vector<16x1xf32> to vector<16x32xf32>
    %365 = arith.subf %352, %364 : vector<16x32xf32>
    %cst_184 = arith.constant 9.99999974E-6 : f32
    %366 = vector.broadcast %cst_184 : f32 to vector<16x1xf32>
    %367 = arith.addf %363, %366 : vector<16x1xf32>
    %368 = math.rsqrt %367 : vector<16x1xf32>
    %369 = vector.broadcast %368 : vector<16x1xf32> to vector<16x32xf32>
    %370 = arith.mulf %365, %369 : vector<16x32xf32>
    %371 = vector.broadcast %201 : vector<1x32xf32> to vector<16x32xf32>
    %372 = arith.mulf %370, %371 : vector<16x32xf32>
    %373 = vector.broadcast %202 : vector<1x32xf32> to vector<16x32xf32>
    %374 = arith.addf %372, %373 : vector<16x32xf32>
    %c224 = arith.constant 224 : index
    %c0_185 = arith.constant 0 : index
    %375 = vector.load %arg3[%c224, %c0_185] : memref<360x64xf32, #tpu.memory_space<vmem>>, vector<32x64xf32>
    %c256 = arith.constant 256 : index
    %c0_186 = arith.constant 0 : index
    %376 = vector.load %arg3[%c256, %c0_186] : memref<360x64xf32, #tpu.memory_space<vmem>>, vector<64x32xf32>
    %cst_187 = arith.constant dense<0.000000e+00> : vector<16x64xf32>
    %377 = tpu.matmul %374, %375, %cst_187 {dimension_numbers = #tpu.dot_dimension_numbers<[1], [0], [0], [1], [0, 0, 1, 1], [], []>} : vector<16x32xf32>, vector<32x64xf32>, vector<16x64xf32> -> vector<16x64xf32>
    %378 = vector.broadcast %205 : vector<1x64xf32> to vector<16x64xf32>
    %379 = arith.addf %377, %378 : vector<16x64xf32>
    %cst_188 = arith.constant 5.000000e-01 : f32
    %380 = vector.broadcast %cst_188 : f32 to vector<16x64xf32>
    %381 = arith.mulf %380, %379 : vector<16x64xf32>
    %cst_189 = arith.constant 0.707106769 : f32
    %382 = vector.broadcast %cst_189 : f32 to vector<16x64xf32>
    %383 = arith.mulf %379, %382 : vector<16x64xf32>
    %384 = math.erf %383 : vector<16x64xf32>
    %cst_190 = arith.constant 1.000000e+00 : f32
    %385 = vector.broadcast %cst_190 : f32 to vector<16x64xf32>
    %386 = arith.addf %385, %384 : vector<16x64xf32>
    %387 = arith.mulf %381, %386 : vector<16x64xf32>
    %cst_191 = arith.constant dense<0.000000e+00> : vector<16x32xf32>
    %388 = tpu.matmul %387, %376, %cst_191 {dimension_numbers = #tpu.dot_dimension_numbers<[1], [0], [0], [1], [0, 0, 1, 1], [], []>} : vector<16x64xf32>, vector<64x32xf32>, vector<16x32xf32> -> vector<16x32xf32>
    %389 = vector.broadcast %206 : vector<1x32xf32> to vector<16x32xf32>
    %390 = arith.addf %388, %389 : vector<16x32xf32>
    %391 = arith.addf %352, %390 : vector<16x32xf32>
    %c328 = arith.constant 328 : index
    %c0_192 = arith.constant 0 : index
    %392 = vector.load %arg3[%c328, %c0_192] : memref<360x64xf32, #tpu.memory_space<vmem>>, vector<32x8xf32>
    %c16 = arith.constant 16 : index
    %c0_193 = arith.constant 0 : index
    %393 = vector.load %arg4[%c16, %c0_193] : memref<72x64xf32, #tpu.memory_space<vmem>>, vector<1x8xf32>
    %cst_194 = arith.constant dense<0.000000e+00> : vector<16x8xf32>
    %394 = tpu.matmul %391, %392, %cst_194 {dimension_numbers = #tpu.dot_dimension_numbers<[1], [0], [0], [1], [0, 0, 1, 1], [], []>} : vector<16x32xf32>, vector<32x8xf32>, vector<16x8xf32> -> vector<16x8xf32>
    %395 = vector.broadcast %393 : vector<1x8xf32> to vector<16x8xf32>
    %396 = arith.addf %394, %395 : vector<16x8xf32>
    %c0_195 = arith.constant 0 : index
    %c0_196 = arith.constant 0 : index
    %397 = vector.load %arg5[%c0_195, %c0_196] : memref<16x8xf32, #tpu.memory_space<vmem>>, vector<16x8xf32>
    tpu.vector_store %arg5[%c0_195, %c0_196], %396 {strides = array<i32>} : memref<16x8xf32, #tpu.memory_space<vmem>>, vector<16x8xf32>,
    return
  }
  func.func @transform_0(%arg0: i32) -> (i32, i32) {
    %c0_i32 = arith.constant 0 : i32
    %c0_i32_0 = arith.constant 0 : i32
    %c0_i32_1 = arith.constant 0 : i32
    return %c0_i32, %c0_i32_0 : i32, i32
  }
  func.func @transform_1(%arg0: i32) -> (i32, i32, i32, i32) {
    %c0_i32 = arith.constant 0 : i32
    %c0_i32_0 = arith.constant 0 : i32
    %c0_i32_1 = arith.constant 0 : i32
    %c0_i32_2 = arith.constant 0 : i32
    %c0_i32_3 = arith.constant 0 : i32
    return %c0_i32, %c0_i32_0, %c0_i32_1, %c0_i32_2 : i32, i32, i32, i32
  }
  func.func @transform_2(%arg0: i32) -> (i32, i32) {
    %c0_i32 = arith.constant 0 : i32
    %c0_i32_0 = arith.constant 0 : i32
    %c0_i32_1 = arith.constant 0 : i32
    return %c0_i32, %c0_i32_0 : i32, i32
  }
  func.func @transform_3(%arg0: i32) -> (i32, i32) {
    %c0_i32 = arith.constant 0 : i32
    %c0_i32_0 = arith.constant 0 : i32
    %c0_i32_1 = arith.constant 0 : i32
    return %c0_i32, %c0_i32_0 : i32, i32
  }
  func.func @transform_4(%arg0: i32) -> (i32, i32) {
    %c0_i32 = arith.constant 0 : i32
    %c0_i32_0 = arith.constant 0 : i32
    %c0_i32_1 = arith.constant 0 : i32
    return %c0_i32, %c0_i32_0 : i32, i32
  }
}

</mosaic_0001>

<bundles_post_ra>
// kernel: aqi_transformer_forward.1
= control target key start
LH: loop header
LB: loop body
LE: loop exit
PB: predicated region body
PF: predicated region fallthrough
CT: control target
= control target key end

     0   :  { %vm29_vm0 = vcmask 1043456   ;;  %vm22_vm1 = vcmask 31744   ;;  %vm118_vm2 = vcmask 261120   ;;  %vm416_vm3 = vcmask 64512   ;;  %s5800_s7 = smov 120   ;;  %s5801_s12 = smov 112   ;;  %s6614_s2 = inlined_call_operand.vmem [shape: f32[360,64], index: 2, kind: input, shape index: {}]   ;;  %s6615_s0 = inlined_call_operand.vmem [shape: f32[16,4], index: 0, kind: input, shape index: {}]   ;;  %s6616_s3 = inlined_call_operand.vmem [shape: f32[72,64], index: 3, kind: input, shape index: {}]   ;;  %s6617_s1 = inlined_call_operand.vmem [shape: f32[2,8,32,8], index: 1, kind: input, shape index: {}]   ;;  %s6618_s4 = inlined_call_operand.vmem [shape: f32[16,8], index: 4, kind: output, shape index: {}]  }
   0x1   :  { %v17_v0 = vld [vmem:[%s6614_s2 + $0x140] sm:$0xf]  ;;  %v19_v2 = vld [vmem:[%s6615_s0 + $0x8] sm:$0xff]  ;;  %v160_v27 = vld [vmem:[%s6614_s2 + $0x10] sm:$0xff]  ;;  %vm504_vm5 = vcmask 130048   ;;  %s5802_s9 = smov 104  }
   0x2   :  { %v18_v1 = vld [vmem:[%s6615_s0] sm:$0xff]  ;;  %4959 = vmatprep.subr.msk.mxu0 %vm29_vm0, %v17_v0  ;;  %v21_v5 = vld [vmem:[%s6616_s3 + $0x8] sm:$0xff]  ;;  %v161_v28 = vld [vmem:[%s6614_s2 + $0x18] sm:$0xff]  ;;  %vm2183_vm6 = vcmask 523264  }
   0x3   :  { %4961 = vmatprep.mubr.msk.f32.mxu0 %vm22_vm1, %v18_v1  ;;  %4960 = vmatpush3.msk.msra.mxu0 %vm29_vm0, %v17_v0  ;;  %v20_v3 = vld [vmem:[%s6616_s3] sm:$0xff]  ;;  %v159_v22 = vld [vmem:[%s6614_s2 + $0x8] sm:$0xff]  ;;  %v5389_v29 = vpack.c.bf16 %v161_v28, %v160_v27  ;;  %v251_v30 = vld [vmem:[%s6617_s1 + $0x10] sm:$0xff] }
   0x4   :  { %4962 = vmatmul.mubr.msk.f32.vlgmr.msra.gmra.mrb[0].mxu0 %vm22_vm1, %v19_v2  ;;  %v158_v21 = vld [vmem:[%s6614_s2] sm:$0xff]  ;;  %v250_v25 = vld [vmem:[%s6617_s1 + $0x8] sm:$0xff]  ;;  %v252_v31 = vld [vmem:[%s6617_s1 + $0x18] sm:$0xff] }
   0x5   :  { %v5385_v23 = vpack.c.bf16 %v159_v22, %v158_v21  ;;  %v249_v24 = vld [vmem:[%s6617_s1] sm:$0xff]  ;;  %v5397_v32 = vpack.c.bf16 %v252_v31, %v251_v30  ;;  %v4528_v34 = vld [vmem:[%s6617_s1 + $0x88] sm:$0xff]  ;;  %v4519_v43 = vld [vmem:[%s6616_s3 + $0x18] ss:$0 sm:$0xff] }
   0x6   :  { %v5393_v26 = vpack.c.bf16 %v250_v25, %v249_v24  ;;  %v4527_v33 = vld [vmem:[%s6617_s1 + $0x80] sm:$0xff]  ;;  %v4520_v45 = vld [vmem:[%s6616_s3 + $0x19] ss:$0 sm:$0xff]  ;;  %v4529_v50 = vld [vmem:[%s6617_s1 + $0x90] sm:$0xff] }
   0x7   :  { %5386 = vmatprep.subr.bf16.mxu1 %v5385_v23  ;;  %v5401_v35 = vpack.c.bf16 %v4528_v34, %v4527_v33  ;;  %v4530_v51 = vld [vmem:[%s6617_s1 + $0x98] sm:$0xff]  ;;  %v4524_v56 = vld [vmem:[%s6616_s3 + $0x20] ss:$0 sm:$0xff]  ;;  %v4541_v60 = vld [vmem:[%s6617_s1 + $0x28] sm:$0xff] }
   0x8   :  { %5388 = vmatpush3.bf16.msra.mxu1 %v5385_v23  ;;  %5394 = vmatprep.subr.bf16.mxu0 %v5393_v26  ;;  %v5405_v54 = vpack.c.bf16 %v4530_v51, %v4529_v50  ;;  %v4521_v55 = vld [vmem:[%s6616_s3 + $0x1c] ss:$0 sm:$0xff]  ;;  %v4540_v59 = vld [vmem:[%s6617_s1 + $0x20] sm:$0xff]  ;;  %vm5927_vm4 = vmpackc.low %vm416_vm3, %vm416_vm3 }
   0x9   :  { %5396 = vmatpush3.bf16.msra.mxu0 %v5393_v26  ;;  %5390 = vmatprep.subr.bf16.mxu1 %v5389_v29  ;;  %v5967_v25 = vld [vmem:[%s6616_s3 + $0x38] sm:$0xff]  ;;  %v5972_v27 = vld [vmem:[%s6616_s3 + $0x40] sm:$0xff] }
   0xa   :  { %5398 = vmatprep.subr.bf16.mxu0 %v5397_v32 }
   0xc   :  { %5392 = vmatpush3.bf16.msra.mxu1 %v5389_v29 }
   0xd   :  { %5400 = vmatpush3.bf16.msra.mxu0 %v5397_v32  ;;  %5402 = vmatprep.subr.bf16.mxu1 %v5401_v35  ;;  %v4544_v32 = vld [vmem:[%s6616_s3 + $0x21] ss:$0 sm:$0xff] }
  0xd7   :  { %v4963_v4 = vpop.f32.mrb[0].mxu0 }
  0xd8   :  { %v99_v6 = vpop.f32.mrb[1].mxu0  ;;  %v5845_v8 = vadd.f32 %v4963_v4, %v21_v5 }
  0xd9   :  { %v5843_v7 = vadd.f32 %v99_v6, %v20_v3  ;;  %v5419_v3 = vpack.c.bf16 %v4541_v60, %v4540_v59  ;;  %v4531_v6 = vld [vmem:[%s6616_s3 + $0x24] ss:$0 sm:$0xff] }
  0xda   :  { %v122_v10 = vsel %vm118_vm2, %v5845_v8, 0.0 }
  0xdb   :  { %v119_v9 = vsel %vm118_vm2, %v5843_v7, 0.0 }
  0xdc   :  { %120 = vadd.xlane.f32.xlu0 %v119_v9 }
  0xe0   :  { %123 = vadd.xlane.f32.xlu0 %v122_v10 }
 0x169   :  { %v121_v11 = vpop.xlane.xlu0 %120 }
 0x16a   :  { %v126_v12 = vmul.f32 0.03125, %v121_v11 }
 0x16c   :  { %v128_v13 = vsub.f32 %v5843_v7, %v126_v12  ;;  %v4542_v12 = vld [vmem:[%s6617_s1 + $0x30] sm:$0xff] }
 0x16d   :  { %v124_v14 = vpop.xlane.xlu0 %123 }
 0x16e   :  { %v127_v15 = vmul.f32 0.03125, %v124_v14  ;;  %v130_v16 = vmul.f32 %v128_v13, %v128_v13 }
 0x170   :  { %v129_v17 = vsub.f32 %v5845_v8, %v127_v15  ;;  %v132_v18 = vsel %vm118_vm2, %v130_v16, 0.0 }
 0x171   :  { %133 = vadd.xlane.f32.xlu1 %v132_v18 }
 0x172   :  { %v131_v19 = vmul.f32 %v129_v17, %v129_v17 }
 0x174   :  { %v135_v20 = vsel %vm118_vm2, %v131_v19, 0.0  ;;  %v4567_v19 = vld [vmem:[%s6617_s1 + $0xc0] sm:$0xff] }
 0x175   :  { %136 = vadd.xlane.f32.xlu1 %v135_v20  ;;  %v4568_v20 = vld [vmem:[%s6617_s1 + $0xc8] sm:$0xff] }
 0x176   :  { %v5453_v24 = vpack.c.bf16 %v4568_v20, %v4567_v19 }
 0x1fe   :  { %v134_v36 = vpop.xlane.xlu1 %133 }
 0x1ff   :  { %v138_v37 = vmul.f32 0.03125, %v134_v36  ;;  %v4570_v36 = vld [vmem:[%s6617_s1 + $0xd8] sm:$0xff] }
 0x201   :  { %v140_v38 = vadd.f32 1e-05, %v138_v37 }
 0x202   :  { %v137_v39 = vpop.xlane.xlu1 %136 }
 0x203   :  { %5710 = vrsqrt.f32 %v140_v38  ;;  %v139_v40 = vmul.f32 0.03125, %v137_v39 }
 0x205   :  { %v141_v41 = vadd.f32 1e-05, %v139_v40 }
 0x207   :  { %5712 = vrsqrt.f32 %v141_v41 }
 0x20d   :  { %v5711_v42 = vpop.eup %5710 }
 0x20e   :  { %v144_v44 = vmul.f32 %v5711_v42, %v128_v13  ;;  %v4543_v13 = vld [vmem:[%s6617_s1 + $0x38] sm:$0xff] }
 0x210   :  { %v150_v46 = vmul.f32 %v4519_v43, %v144_v44 }
 0x211   :  { %v5713_v47 = vpop.eup %5712 }
 0x212   :  { %v5891_v48 = vadd.f32 %v4520_v45, %v150_v46  ;;  %v145_v49 = vmul.f32 %v5713_v47, %v129_v17  ;;  %v5423_v17 = vpack.c.bf16 %v4543_v13, %v4542_v12  ;;  %v4549_v12 = vld [vmem:[%s6617_s1 + $0xb0] sm:$0xff]  ;;  %v4550_v13 = vld [vmem:[%s6617_s1 + $0xb8] sm:$0xff] }
 0x214   :  { %v151_v52 = vmul.f32 %v4519_v43, %v145_v49  ;;  %4972 = vmatprep.mubr.msk.f32.mxu1 %vm118_vm2, %v5891_v48  ;;  %4983 = vmatprep.mubr.msk.f32.mxu0 %vm118_vm2, %v5891_v48 }
 0x216   :  { %v5903_v53 = vadd.f32 %v4520_v45, %v151_v52  ;;  %v4547_v52 = vld [vmem:[%s6617_s1 + $0xa0] sm:$0xff] }
 0x218   :  { %4973 = vmatmul.mubr.msk.f32.vlgmr.msra.gmra.mrb[0].mxu1 %vm118_vm2, %v5903_v53  ;;  %4984 = vmatmul.mubr.msk.f32.vlgmr.msra.gmra.mrb[2].mxu0 %vm118_vm2, %v5903_v53 }
 0x219   :  { %5404 = vmatpush3.bf16.msra.mxu1 %v5401_v35  ;;  %4994 = vmatprep.mubr.msk.f32.mxu1 %vm118_vm2, %v5891_v48  ;;  %v4569_v35 = vld [vmem:[%s6617_s1 + $0xd0] sm:$0xff] }
 0x21a   :  { %5406 = vmatprep.subr.bf16.mxu1 %v5405_v54  ;;  %v5457_v40 = vpack.c.bf16 %v4570_v36, %v4569_v35 }
 0x21d   :  { %5408 = vmatpush3.bf16.msra.mxu1 %v5405_v54  ;;  %v4548_v54 = vld [vmem:[%s6617_s1 + $0xa8] sm:$0xff] }
 0x220   :  { %4995 = vmatmul.mubr.msk.f32.vlgmr.msra.gmra.mrb[2].mxu1 %vm118_vm2, %v5903_v53 }
 0x2eb   :  { %v4974_v57 = vpop.f32.mrb[0].mxu1  ;;  %v4985_v58 = vpop.f32.mrb[2].mxu0 }
 0x2ec   :  { %v244_v61 = vadd.f32 %v4974_v57, %v4521_v55  ;;  %v238_v62 = vpop.f32.mrb[1].mxu1  ;;  %v323_v63 = vpop.f32.mrb[3].mxu0  ;;  %v329_v15 = vadd.f32 %v4985_v58, %v4524_v56 }
 0x2ed   :  { %v239_v0 = vadd.f32 %v4521_v55, %v238_v62  ;;  %v324_v1 = vadd.f32 %v4524_v56, %v323_v63  ;;  %v5427_v55 = vpack.c.bf16 %v4548_v54, %v4547_v52 }
 0x2ef   :  { %5001 = vmatprep.mubr.msk.f32.mxu0 %vm416_vm3, %v324_v1  ;;  %v5932_v4 = vpack.i.bf16 %v244_v61, %v239_v0  ;;  %v5409_v5 = vpack.c.bf16 %v244_v61, %v239_v0  ;;  %v4571_v61 = vld [vmem:[%s6616_s3 + $0x26] ss:$0 sm:$0xff] }
 0x2f1   :  { %5681 = vrot.lane.b32.xlu0 %v5932_v4, %s5800_s7  ;;  %5411 = vmatprep.subr.msk.bf16.mxu0 %vm5927_vm4, %v5409_v5 }
 0x2f2   :  { %5414 = vmatpush3.bf16.xpose.msk.msra.mxu0 %vm5927_vm4, %v5409_v5 }
 0x2f3   :  { %v4996_v9 = vpop.f32.mrb[2].mxu1  ;;  %5420 = vmatprep.subr.bf16.mxu0 %v5419_v3 }
 0x2f4   :  { %v413_v10 = vadd.f32 %v4996_v9, %v4531_v6  ;;  %v407_v11 = vpop.f32.mrb[3].mxu1 }
 0x2f5   :  { %v408_v14 = vadd.f32 %v4531_v6, %v407_v11 }
 0x2f7   :  { %v5415_v16 = vpack.c.bf16 %v413_v10, %v408_v14 }
 0x2f9   :  { %5416 = vmatprep.subr.bf16.mxu1 %v5415_v16  ;;  %5002 = vmatmul.mubr.msk.f32.vlgmr.msra.gmra.mrb[4].mxu0 %vm416_vm3, %v329_v15 }
 0x2fa   :  { %5418 = vmatpush3.bf16.msra.mxu1 %v5415_v16  ;;  %5422 = vmatpush3.bf16.msra.mxu0 %v5419_v3  ;;  %v5431_v16 = vpack.c.bf16 %v4550_v13, %v4549_v12 }
 0x2fb   :  { %5019 = vmatprep.mubr.msk.f32.mxu0 %vm118_vm2, %v5891_v48  ;;  %5424 = vmatprep.subr.bf16.mxu0 %v5423_v17 }
 0x2fc   :  { %5428 = vmatprep.subr.bf16.mxu1 %v5427_v55 }
 0x2fe   :  { %5426 = vmatpush3.bf16.msra.mxu0 %v5423_v17 }
 0x301   :  { %5020 = vmatmul.mubr.msk.f32.vlgmr.msra.gmra.mrb[6].mxu0 %vm118_vm2, %v5903_v53 }
 0x363   :  { %v5682_v18 = vpop.permute.xlu0 %5681 }
 0x364   :  { %v5684_v21 = vunpack.i.h.bf16 %v5682_v18  ;;  %v5683_v22 = vunpack.i.l.bf16 %v5682_v18 }
 0x366   :  { %v5435_v23 = vpack.c.bf16 %v5684_v21, %v5683_v22 }
 0x368   :  { %5437 = vmatprep.subr.msk.bf16.mxu0 %vm5927_vm4, %v5435_v23 }
 0x369   :  { %5440 = vmatpush3.bf16.xpose.msk.msra.mxu0 %vm5927_vm4, %v5435_v23 }
 0x36a   :  { %5454 = vmatprep.subr.bf16.mxu0 %v5453_v24 }
 0x3cc   :  { %v5003_v26 = vpop.f32.mrb[4].mxu0 }
 0x3cd   :  { %v495_v28 = vpop.f32.mrb[5].mxu0  ;;  %v501_v30 = vadd.f32 %v5003_v26, %v5972_v27 }
 0x3ce   :  { %v496_v29 = vadd.f32 %v495_v28, %v5967_v25 }
 0x3cf   :  { %v508_v34 = vsel %vm504_vm5, %v501_v30, -inf }
 0x3d0   :  { %v505_v31 = vsel %vm504_vm5, %v496_v29, -inf }
 0x3d1   :  { %506 = vmax.xlane.f32.xlu1 %v505_v31 }
 0x3d4   :  { %v5021_v33 = vpop.f32.mrb[6].mxu0 }
 0x3d5   :  { %v685_v37 = vpop.f32.mrb[7].mxu0  ;;  %509 = vmax.xlane.f32.xlu1 %v508_v34  ;;  %v691_v39 = vadd.f32 %v5021_v33, %v4544_v32  ;;  %v4551_v34 = vld [vmem:[%s6616_s3 + $0x25] ss:$0 sm:$0xff] }
 0x3d6   :  { %v686_v38 = vadd.f32 %v4544_v32, %v685_v37 }
 0x3d8   :  { %5037 = vmatprep.mubr.msk.f32.mxu0 %vm416_vm3, %v686_v38 }
 0x3d9   :  { %5038 = vmatmul.mubr.msk.f32.vlgmr.msra.gmra.mrb[8].mxu0 %vm416_vm3, %v691_v39  ;;  %v4560_v39 = vld [vmem:[%s6617_s1 + $0x40] sm:$0xff] }
 0x3da   :  { %5456 = vmatpush3.bf16.msra.mxu0 %v5453_v24  ;;  %5066 = vmatprep.mubr.msk.f32.mxu0 %vm118_vm2, %v5891_v48 }
 0x3db   :  { %5458 = vmatprep.subr.bf16.mxu0 %v5457_v40 }
 0x3de   :  { %5460 = vmatpush3.bf16.msra.mxu0 %v5457_v40  ;;  %v4561_v40 = vld [vmem:[%s6617_s1 + $0x48] sm:$0xff] }
 0x3e1   :  { %5067 = vmatmul.mubr.msk.f32.vlgmr.msra.gmra.mrb[10].mxu0 %vm118_vm2, %v5903_v53 }
 0x45e   :  { %v507_v41 = vpop.xlane.xlu1 %506 }
 0x45f   :  { %v511_v42 = vsub.f32 %v496_v29, %v507_v41 }
 0x461   :  { %v513_v43 = vmul.f32 1.442695, %v511_v42 }
 0x462   :  { %v510_v44 = vpop.xlane.xlu1 %509 }
 0x463   :  { %5714 = vpow2.f32 %v513_v43  ;;  %v512_v45 = vsub.f32 %v501_v30, %v510_v44  ;;  %v5445_v43 = vpack.c.bf16 %v4561_v40, %v4560_v39 }
 0x465   :  { %v515_v46 = vmul.f32 1.442695, %v512_v45  ;;  %v4562_v45 = vld [vmem:[%s6617_s1 + $0x50] sm:$0xff] }
 0x467   :  { %5716 = vpow2.f32 %v515_v46  ;;  %v4563_v46 = vld [vmem:[%s6617_s1 + $0x58] sm:$0xff] }
 0x46d   :  { %v5715_v47 = vpop.eup %5714 }
 0x46e   :  { %v517_v49 = vsel %vm504_vm5, %v5715_v47, 0.0 }
 0x46f   :  { %518 = vadd.xlane.f32.xlu1 %v517_v49 }
 0x471   :  { %v5717_v50 = vpop.eup %5716 }
 0x472   :  { %v520_v51 = vsel %vm504_vm5, %v5717_v50, 0.0 }
 0x473   :  { %521 = vadd.xlane.f32.xlu1 %v520_v51 }
 0x4ac   :  { %v5039_v56 = vpop.f32.mrb[8].mxu0 }
 0x4ad   :  { %v858_v57 = vpop.f32.mrb[9].mxu0  ;;  %v864_v59 = vadd.f32 %v5039_v56, %v5972_v27  ;;  %v4588_v56 = vld [vmem:[%s6617_s1 + $0xe8] sm:$0xff] }
 0x4ae   :  { %v859_v58 = vadd.f32 %v858_v57, %v5967_v25 }
 0x4af   :  { %v870_v63 = vsel %vm504_vm5, %v864_v59, -inf }
 0x4b0   :  { %v867_v60 = vsel %vm504_vm5, %v859_v58, -inf }
 0x4b1   :  { %868 = vmax.xlane.f32.xlu1 %v867_v60  ;;  %v4564_v60 = vld [vmem:[%s6616_s3 + $0x22] ss:$0 sm:$0xff] }
 0x4b4   :  { %v5068_v62 = vpop.f32.mrb[10].mxu0 }
 0x4b5   :  { %v1137_v0 = vadd.f32 %v5068_v62, %v4571_v61  ;;  %v1131_v1 = vpop.f32.mrb[11].mxu0  ;;  %871 = vmax.xlane.f32.xlu1 %v870_v63  ;;  %v4589_v62 = vld [vmem:[%s6617_s1 + $0xf0] sm:$0xff]  ;;  %v4590_v63 = vld [vmem:[%s6617_s1 + $0xf8] sm:$0xff] }
 0x4b6   :  { %v1132_v3 = vadd.f32 %v4571_v61, %v1131_v1 }
 0x4b8   :  { %v5467_v5 = vpack.c.bf16 %v1137_v0, %v1132_v3 }
 0x4ba   :  { %5468 = vmatprep.subr.bf16.mxu0 %v5467_v5 }
 0x4bb   :  { %5470 = vmatpush3.bf16.msra.mxu0 %v5467_v5  ;;  %v5483_v5 = vpack.c.bf16 %v4590_v63, %v4589_v62 }
 0x4fc   :  { %v519_v6 = vpop.xlane.xlu1 %518 }
 0x4fd   :  { %5718 = vrcp.f32 %v519_v6 }
 0x500   :  { %v522_v9 = vpop.xlane.xlu1 %521 }
 0x501   :  { %5720 = vrcp.f32 %v522_v9 }
 0x507   :  { %v5719_v10 = vpop.eup %5718 }
 0x508   :  { %v525_v11 = vmul.f32 %v5719_v10, %v5715_v47 }
 0x50a   :  { %5008 = vmatprep.mubr.msk.f32.mxu1 %vm504_vm5, %v525_v11 }
 0x50b   :  { %v5721_v14 = vpop.eup %5720 }
 0x50c   :  { %v526_v15 = vmul.f32 %v5721_v14, %v5717_v50  ;;  %v5449_v50 = vpack.c.bf16 %v4563_v46, %v4562_v45  ;;  %v4591_v14 = vld [vmem:[%s6616_s3 + $0x27] ss:$0 sm:$0xff] }
 0x50e   :  { %5009 = vmatmul.mubr.msk.f32.vlgmr.msra.gmra.mrb[4].mxu1 %vm504_vm5, %v526_v15 }
 0x50f   :  { %5430 = vmatpush3.bf16.msra.mxu1 %v5427_v55  ;;  %5030 = vmatprep.mubr.msk.f32.mxu1 %vm118_vm2, %v5891_v48  ;;  %v4587_v55 = vld [vmem:[%s6617_s1 + $0xe0] sm:$0xff] }
 0x510   :  { %5432 = vmatprep.subr.bf16.mxu1 %v5431_v16  ;;  %v5479_v57 = vpack.c.bf16 %v4588_v56, %v4587_v55 }
 0x513   :  { %5434 = vmatpush3.bf16.msra.mxu1 %v5431_v16 }
 0x516   :  { %5031 = vmatmul.mubr.msk.f32.vlgmr.msra.gmra.mrb[6].mxu1 %vm118_vm2, %v5903_v53 }
 0x53e   :  { %v869_v17 = vpop.xlane.xlu1 %868 }
 0x53f   :  { %v873_v18 = vsub.f32 %v859_v58, %v869_v17 }
 0x541   :  { %v875_v19 = vmul.f32 1.442695, %v873_v18 }
 0x542   :  { %v872_v20 = vpop.xlane.xlu1 %871 }
 0x543   :  { %5722 = vpow2.f32 %v875_v19  ;;  %v874_v21 = vsub.f32 %v864_v59, %v872_v20 }
 0x545   :  { %v877_v22 = vmul.f32 1.442695, %v874_v21 }
 0x547   :  { %5724 = vpow2.f32 %v877_v22 }
 0x54d   :  { %v5723_v23 = vpop.eup %5722 }
 0x54e   :  { %v879_v24 = vsel %vm504_vm5, %v5723_v23, 0.0 }
 0x54f   :  { %880 = vadd.xlane.f32.xlu0 %v879_v24 }
 0x551   :  { %v5725_v26 = vpop.eup %5724 }
 0x552   :  { %v882_v28 = vsel %vm504_vm5, %v5725_v26, 0.0 }
 0x553   :  { %883 = vadd.xlane.f32.xlu1 %v882_v28 }
 0x564   :  { %5686 = vrot.lane.b32.xlu1 %v5932_v4, %s5801_s12 }
 0x5dc   :  { %v881_v29 = vpop.xlane.xlu0 %880 }
 0x5dd   :  { %5726 = vrcp.f32 %v881_v29 }
 0x5e0   :  { %v884_v30 = vpop.xlane.xlu1 %883 }
 0x5e1   :  { %v6024_v31 = vpop.f32.mrb[4].mxu1  ;;  %5728 = vrcp.f32 %v884_v30 }
 0x5e2   :  { %v6026_v32 = vpop.f32.mrb[5].mxu1 }
 0x5e4   :  { %v5687_v47 = vpop.permute.xlu1 %5686 }
 0x5e5   :  { %v5689_v51 = vunpack.i.h.bf16 %v5687_v47  ;;  %v5688_v52 = vunpack.i.l.bf16 %v5687_v47 }
 0x5e7   :  { %v5727_v33 = vpop.eup %5726  ;;  %v5461_v54 = vpack.c.bf16 %v5689_v51, %v5688_v52  ;;  %v4584_v52 = vld [vmem:[%s6616_s3 + $0x23] ss:$0 sm:$0xff] }
 0x5e8   :  { %v887_v35 = vmul.f32 %v5727_v33, %v5723_v23 }
 0x5e9   :  { %v5032_v36 = vpop.f32.mrb[6].mxu1 }
 0x5ea   :  { %v775_v37 = vadd.f32 %v5032_v36, %v4551_v34  ;;  %v769_v38 = vpop.f32.mrb[7].mxu1  ;;  %5044 = vmatprep.mubr.msk.f32.mxu1 %vm504_vm5, %v887_v35  ;;  %v4581_v35 = vld [vmem:[%s6617_s1 + $0x68] sm:$0xff] }
 0x5eb   :  { %v770_v41 = vadd.f32 %v4551_v34, %v769_v38  ;;  %v5729_v44 = vpop.eup %5728  ;;  %v4580_v34 = vld [vmem:[%s6617_s1 + $0x60] sm:$0xff] }
 0x5ec   :  { %v888_v49 = vmul.f32 %v5729_v44, %v5725_v26  ;;  %v5471_v36 = vpack.c.bf16 %v4581_v35, %v4580_v34 }
 0x5ed   :  { %v5441_v42 = vpack.c.bf16 %v775_v37, %v770_v41  ;;  %v4583_v41 = vld [vmem:[%s6617_s1 + $0x78] sm:$0xff] }
 0x5ee   :  { %5472 = vmatprep.subr.bf16.mxu0 %v5471_v36 }
 0x5ef   :  { %5442 = vmatprep.subr.bf16.mxu1 %v5441_v42 }
 0x5f0   :  { %5444 = vmatpush3.bf16.msra.mxu1 %v5441_v42 }
 0x5f1   :  { %5446 = vmatprep.subr.bf16.mxu1 %v5445_v43 }
 0x5f3   :  { %5045 = vmatmul.mubr.msk.f32.vlgmr.msra.gmra.mrb[8].mxu1 %vm504_vm5, %v888_v49 }
 0x5f4   :  { %5448 = vmatpush3.bf16.msra.mxu1 %v5445_v43  ;;  %5055 = vmatprep.mubr.msk.f32.mxu1 %vm118_vm2, %v5891_v48 }
 0x5f5   :  { %5450 = vmatprep.subr.bf16.mxu1 %v5449_v50 }
 0x5f8   :  { %5452 = vmatpush3.bf16.msra.mxu1 %v5449_v50 }
 0x5f9   :  { %5463 = vmatprep.subr.msk.bf16.mxu1 %vm5927_vm4, %v5461_v54 }
 0x5fb   :  { %5056 = vmatmul.mubr.msk.f32.vlgmr.msra.gmra.mrb[10].mxu1 %vm118_vm2, %v5903_v53 }
 0x601   :  { %5466 = vmatpush3.bf16.xpose.msk.msra.mxu1 %vm5927_vm4, %v5461_v54 }
 0x602   :  { %5480 = vmatprep.subr.bf16.mxu1 %v5479_v57 }
 0x6c6   :  { %v6059_v58 = vpop.f32.mrb[8].mxu1 }
 0x6c7   :  { %v6061_v59 = vpop.f32.mrb[9].mxu1 }
 0x6ce   :  { %v5057_v61 = vpop.f32.mrb[10].mxu1 }
 0x6cf   :  { %v1047_v0 = vpop.f32.mrb[11].mxu1  ;;  %v1053_v3 = vadd.f32 %v5057_v61, %v4564_v60 }
 0x6d0   :  { %v1048_v1 = vadd.f32 %v4564_v60, %v1047_v0 }
 0x6d2   :  { %5073 = vmatprep.mubr.msk.f32.mxu1 %vm416_vm3, %v1048_v1 }
 0x6d3   :  { %5074 = vmatmul.mubr.msk.f32.vlgmr.msra.gmra.mrb[12].mxu1 %vm416_vm3, %v1053_v3 }
 0x6d4   :  { %5482 = vmatpush3.bf16.msra.mxu1 %v5479_v57  ;;  %5102 = vmatprep.mubr.msk.f32.mxu1 %vm118_vm2, %v5891_v48 }
 0x6d5   :  { %5484 = vmatprep.subr.bf16.mxu1 %v5483_v5 }
 0x6d8   :  { %5486 = vmatpush3.bf16.msra.mxu1 %v5483_v5 }
 0x6db   :  { %5103 = vmatmul.mubr.msk.f32.vlgmr.msra.gmra.mrb[14].mxu1 %vm118_vm2, %v5903_v53 }
 0x7a6   :  { %v5075_v6 = vpop.f32.mrb[12].mxu1 }
 0x7a7   :  { %v1226_v9 = vadd.f32 %v5075_v6, %v5972_v27  ;;  %v1220_v10 = vpop.f32.mrb[13].mxu1 }
 0x7a8   :  { %v1221_v11 = vadd.f32 %v1220_v10, %v5967_v25 }
 0x7a9   :  { %v1232_v12 = vsel %vm504_vm5, %v1226_v9, -inf }
 0x7aa   :  { %1233 = vmax.xlane.f32.xlu0 %v1232_v12  ;;  %v1229_v13 = vsel %vm504_vm5, %v1221_v11, -inf }
 0x7ab   :  { %1230 = vmax.xlane.f32.xlu1 %v1229_v13 }
 0x7ae   :  { %v5104_v15 = vpop.f32.mrb[14].mxu1 }
 0x7af   :  { %v1499_v16 = vadd.f32 %v5104_v15, %v4591_v14  ;;  %v1493_v17 = vpop.f32.mrb[15].mxu1 }
 0x7b0   :  { %v1494_v18 = vadd.f32 %v4591_v14, %v1493_v17  ;;  %v1695_v14 = vld [vmem:[%s6614_s2 + $0x28] sm:$0xff] }
 0x7b2   :  { %v5493_v19 = vpack.c.bf16 %v1499_v16, %v1494_v18 }
 0x7b4   :  { %5494 = vmatprep.subr.bf16.mxu1 %v5493_v19 }
 0x7b5   :  { %5496 = vmatpush3.bf16.msra.mxu1 %v5493_v19 }
 0x7b6   :  { %5119 = vmatprep.subr.mxu1 %v1695_v14 }
 0x837   :  { %v1234_v20 = vpop.xlane.xlu0 %1233 }
 0x838   :  { %v1236_v21 = vsub.f32 %v1226_v9, %v1234_v20  ;;  %v1231_v22 = vpop.xlane.xlu1 %1230 }
 0x839   :  { %v1235_v23 = vsub.f32 %v1221_v11, %v1231_v22  ;;  %v1696_v22 = vld [vmem:[%s6614_s2 + $0x30] sm:$0xff] }
 0x83a   :  { %v1239_v24 = vmul.f32 1.442695, %v1236_v21  ;;  %v1694_v21 = vld [vmem:[%s6614_s2 + $0x20] sm:$0xff] }
 0x83b   :  { %v1237_v26 = vmul.f32 1.442695, %v1235_v23  ;;  %v1697_v23 = vld [vmem:[%s6614_s2 + $0x38] sm:$0xff] }
 0x83d   :  { %5730 = vpow2.f32 %v1237_v26 }
 0x83e   :  { %5732 = vpow2.f32 %v1239_v24  ;;  %v4608_v24 = vld [vmem:[%s6616_s3 + $0x1d] ss:$0 sm:$0xff] }
 0x847   :  { %v5731_v28 = vpop.eup %5730 }
 0x848   :  { %v1241_v29 = vsel %vm504_vm5, %v5731_v28, 0.0  ;;  %v5733_v30 = vpop.eup %5732 }
 0x849   :  { %1242 = vadd.xlane.f32.xlu0 %v1241_v29  ;;  %v1244_v33 = vsel %vm504_vm5, %v5733_v30, 0.0 }
 0x84d   :  { %1245 = vadd.xlane.f32.xlu0 %v1244_v33 }
 0x863   :  { %5691 = vrot.lane.b32.xlu0 %v5932_v4, %s5802_s9  ;;  %v4582_v4 = vld [vmem:[%s6617_s1 + $0x70] sm:$0xff] }
 0x864   :  { %v5475_v45 = vpack.c.bf16 %v4583_v41, %v4582_v4 }
 0x8d6   :  { %v1243_v37 = vpop.xlane.xlu0 %1242 }
 0x8d7   :  { %5734 = vrcp.f32 %v1243_v37 }
 0x8da   :  { %v1246_v38 = vpop.xlane.xlu0 %1245 }
 0x8db   :  { %5736 = vrcp.f32 %v1246_v38 }
 0x8de   :  { %v5692_v43 = vpop.permute.xlu0 %5691 }
 0x8df   :  { %v5694_v46 = vunpack.i.h.bf16 %v5692_v43  ;;  %v5693_v47 = vunpack.i.l.bf16 %v5692_v43  ;;  %v2073_v43 = vld [vmem:[%s6614_s2 + $0x48] sm:$0xff] }
 0x8e1   :  { %v5735_v39 = vpop.eup %5734  ;;  %v5487_v49 = vpack.c.bf16 %v5694_v46, %v5693_v47  ;;  %v2075_v46 = vld [vmem:[%s6614_s2 + $0x58] sm:$0xff] }
 0x8e2   :  { %v1249_v40 = vmul.f32 %v5735_v39, %v5731_v28 }
 0x8e4   :  { %5080 = vmatprep.mubr.msk.f32.mxu0 %vm504_vm5, %v1249_v40 }
 0x8e5   :  { %v5737_v42 = vpop.eup %5736 }
 0x8e6   :  { %v1250_v44 = vmul.f32 %v5737_v42, %v5733_v30  ;;  %v2072_v42 = vld [vmem:[%s6614_s2 + $0x40] sm:$0xff] }
 0x8e8   :  { %5081 = vmatmul.mubr.msk.f32.vlgmr.msra.gmra.mrb[12].mxu0 %vm504_vm5, %v1250_v44  ;;  %v5497_v44 = vpack.c.bf16 %v2073_v43, %v2072_v42 }
 0x8e9   :  { %5474 = vmatpush3.bf16.msra.mxu0 %v5471_v36  ;;  %5091 = vmatprep.mubr.msk.f32.mxu0 %vm118_vm2, %v5891_v48 }
 0x8ea   :  { %5476 = vmatprep.subr.bf16.mxu0 %v5475_v45 }
 0x8ed   :  { %5478 = vmatpush3.bf16.msra.mxu0 %v5475_v45  ;;  %v2074_v45 = vld [vmem:[%s6614_s2 + $0x50] sm:$0xff] }
 0x8ee   :  { %5489 = vmatprep.subr.msk.bf16.mxu0 %vm5927_vm4, %v5487_v49  ;;  %v5501_v47 = vpack.c.bf16 %v2075_v46, %v2074_v45 }
 0x8f0   :  { %5092 = vmatmul.mubr.msk.f32.vlgmr.msra.gmra.mrb[14].mxu0 %vm118_vm2, %v5903_v53 }
 0x8f6   :  { %5492 = vmatpush3.bf16.xpose.msk.msra.mxu0 %vm5927_vm4, %v5487_v49 }
 0x8f7   :  { %5498 = vmatprep.subr.bf16.mxu0 %v5497_v44 }
 0x9bb   :  { %v5082_v50 = vpop.f32.mrb[12].mxu0 }
 0x9bc   :  { %v1323_v51 = vpop.f32.mrb[13].mxu0 }
 0x9c3   :  { %v5093_v54 = vpop.f32.mrb[14].mxu0 }
 0x9c4   :  { %v1409_v48 = vpop.f32.mrb[15].mxu0  ;;  %v1415_v56 = vadd.f32 %v5093_v54, %v4584_v52 }
 0x9c5   :  { %v1410_v55 = vadd.f32 %v4584_v52, %v1409_v48 }
 0x9c7   :  { %5109 = vmatprep.mubr.msk.f32.mxu0 %vm416_vm3, %v1410_v55 }
 0x9c8   :  { %5110 = vmatmul.mubr.msk.f32.vlgmr.msra.gmra.mrb[16].mxu0 %vm416_vm3, %v1415_v56  ;;  %v4609_v56 = vld [vmem:[%s6616_s3 + $0x1a] ss:$0 sm:$0xff] }
 0x9c9   :  { %5500 = vmatpush3.bf16.msra.mxu0 %v5497_v44 }
 0x9ca   :  { %5502 = vmatprep.subr.bf16.mxu0 %v5501_v47 }
 0x9cd   :  { %5504 = vmatpush3.bf16.msra.mxu0 %v5501_v47 }
 0xa9b   :  { %v5111_v57 = vpop.f32.mrb[16].mxu0 }
 0xa9c   :  { %v1582_v60 = vpop.f32.mrb[17].mxu0  ;;  %v1588_v61 = vadd.f32 %v5111_v57, %v5972_v27 }
 0xa9d   :  { %v1583_v53 = vadd.f32 %v1582_v60, %v5967_v25  ;;  %v4610_v60 = vld [vmem:[%s6616_s3 + $0x1b] ss:$0 sm:$0xff] }
 0xa9e   :  { %v1594_v63 = vsel %vm504_vm5, %v1588_v61, -inf }
 0xa9f   :  { %v1591_v62 = vsel %vm504_vm5, %v1583_v53, -inf }
 0xaa0   :  { %1592 = vmax.xlane.f32.xlu1 %v1591_v62 }
 0xaa4   :  { %1595 = vmax.xlane.f32.xlu1 %v1594_v63 }
 0xb2d   :  { %v1593_v0 = vpop.xlane.xlu1 %1592 }
 0xb2e   :  { %v1597_v1 = vsub.f32 %v1583_v53, %v1593_v0 }
 0xb30   :  { %v1599_v3 = vmul.f32 1.442695, %v1597_v1 }
 0xb31   :  { %v1596_v5 = vpop.xlane.xlu1 %1595 }
 0xb32   :  { %5738 = vpow2.f32 %v1599_v3  ;;  %v1598_v6 = vsub.f32 %v1588_v61, %v1596_v5  ;;  %v2076_v3 = vld [vmem:[%s6614_s2 + $0x60] sm:$0xff]  ;;  %v2077_v5 = vld [vmem:[%s6614_s2 + $0x68] sm:$0xff] }
 0xb34   :  { %v1601_v9 = vmul.f32 1.442695, %v1598_v6  ;;  %v5505_v6 = vpack.c.bf16 %v2077_v5, %v2076_v3 }
 0xb36   :  { %5740 = vpow2.f32 %v1601_v9  ;;  %5506 = vmatprep.subr.bf16.mxu0 %v5505_v6  ;;  %v2078_v9 = vld [vmem:[%s6614_s2 + $0x70] sm:$0xff] }
 0xb3c   :  { %v5739_v10 = vpop.eup %5738 }
 0xb3d   :  { %v1603_v11 = vsel %vm504_vm5, %v5739_v10, 0.0 }
 0xb3e   :  { %1604 = vadd.xlane.f32.xlu0 %v1603_v11 }
 0xb40   :  { %v5741_v12 = vpop.eup %5740 }
 0xb41   :  { %v1606_v13 = vsel %vm504_vm5, %v5741_v12, 0.0 }
 0xb42   :  { %1607 = vadd.xlane.f32.xlu1 %v1606_v13  ;;  %v2081_v13 = vld [vmem:[%s6614_s2 + $0x88] sm:$0xff] }
 0xbcb   :  { %v1605_v15 = vpop.xlane.xlu0 %1604 }
 0xbcc   :  { %5742 = vrcp.f32 %v1605_v15  ;;  %v2082_v15 = vld [vmem:[%s6614_s2 + $0x90] sm:$0xff] }
 0xbcf   :  { %v1608_v16 = vpop.xlane.xlu1 %1607 }
 0xbd0   :  { %5744 = vrcp.f32 %v1608_v16  ;;  %v2083_v16 = vld [vmem:[%s6614_s2 + $0x98] sm:$0xff] }
 0xbd6   :  { %v5743_v17 = vpop.eup %5742 }
 0xbd7   :  { %v1611_v18 = vmul.f32 %v5743_v17, %v5739_v10  ;;  %v2079_v10 = vld [vmem:[%s6614_s2 + $0x78] sm:$0xff]  ;;  %v5517_v17 = vpack.c.bf16 %v2083_v16, %v2082_v15  ;;  %v4618_v15 = vld [vmem:[%s6616_s3 + $0x29] ss:$0 sm:$0xff] }
 0xbd8   :  { %v5509_v11 = vpack.c.bf16 %v2079_v10, %v2078_v9 }
 0xbd9   :  { %5116 = vmatprep.mubr.msk.f32.mxu1 %vm504_vm5, %v1611_v18  ;;  %v4611_v18 = vld [vmem:[%s6616_s3 + $0x1e] ss:$0 sm:$0xff] }
 0xbda   :  { %v5745_v19 = vpop.eup %5744 }
 0xbdb   :  { %v1612_v20 = vmul.f32 %v5745_v19, %v5741_v12  ;;  %v2080_v12 = vld [vmem:[%s6614_s2 + $0x80] sm:$0xff] }
 0xbdd   :  { %5117 = vmatmul.mubr.msk.f32.vlgmr.msra.gmra.mrb[16].mxu1 %vm504_vm5, %v1612_v20 }
 0xbde   :  { %5121 = vmatprep.mubr.msk.f32.mxu1 %vm416_vm3, %v6061_v59  ;;  %5120 = vmatpush3.msra.mxu1 %v1695_v14  ;;  %v5513_v14 = vpack.c.bf16 %v2081_v13, %v2080_v12  ;;  %v4617_v13 = vld [vmem:[%s6616_s3 + $0x28] ss:$0 sm:$0xff] }
 0xbdf   :  { %5124 = vmatprep.subr.mxu1 %v1694_v21 }
 0xbe1   :  { %5122 = vmatmul.mubr.msk.f32.vlgmr.msra.gmra.mrb[18].mxu1 %vm416_vm3, %v6059_v58 }
 0xbe2   :  { %5126 = vmatprep.mubr.msk.f32.mxu1 %vm416_vm3, %v6026_v32  ;;  %5125 = vmatpush3.msra.mxu1 %v1694_v21 }
 0xbe3   :  { %5129 = vmatprep.subr.mxu1 %v1696_v22 }
 0xbe9   :  { %5127 = vmatmul.mubr.msk.f32.vlgmr.msra.gmra.mrb[18].mxu1 %vm416_vm3, %v6024_v31 }
 0xbea   :  { %5131 = vmatprep.mubr.msk.f32.mxu1 %vm416_vm3, %v1323_v51  ;;  %5130 = vmatpush3.msra.mxu1 %v1696_v22 }
 0xbeb   :  { %5134 = vmatprep.subr.mxu1 %v1697_v23 }
 0xbf1   :  { %5132 = vmatmul.mubr.msk.f32.vlgmr.msra.gmra.mrb[18].mxu1 %vm416_vm3, %v5082_v50 }
 0xbf2   :  { %5135 = vmatpush3.msra.mxu1 %v1697_v23 }
 0xcb0   :  { %v5118_v58 = vpop.f32.mrb[16].mxu1 }
 0xcb1   :  { %v1685_v59 = vpop.f32.mrb[17].mxu1 }
 0xcb2   :  { %5136 = vmatprep.mubr.msk.f32.mxu1 %vm416_vm3, %v1685_v59 }
 0xcb3   :  { %5137 = vmatmul.mubr.msk.f32.vlgmr.msra.gmra.mrb[18].mxu1 %vm416_vm3, %v5118_v58 }
 0xd86   :  { %v5138_v32 = vpop.f32.mrb[18].mxu1 }
 0xd87   :  { %v2015_v26 = vpop.f32.mrb[19].mxu1  ;;  %v2027_v31 = vadd.f32 %v5138_v32, %v5845_v8 }
 0xd88   :  { %v2026_v28 = vadd.f32 %v2015_v26, %v5843_v7 }
 0xd89   :  { %v6155_v30 = vadd.f32 %v4608_v24, %v2027_v31 }
 0xd8a   :  { %v6153_v29 = vadd.f32 %v4608_v24, %v2026_v28 }
 0xd8b   :  { %v2037_v34 = vsel %vm118_vm2, %v6155_v30, 0.0 }
 0xd8c   :  { %v2034_v33 = vsel %vm118_vm2, %v6153_v29, 0.0 }
 0xd8d   :  { %2035 = vadd.xlane.f32.xlu1 %v2034_v33 }
 0xd91   :  { %2038 = vadd.xlane.f32.xlu1 %v2037_v34 }
 0xe1a   :  { %v2036_v35 = vpop.xlane.xlu1 %2035 }
 0xe1b   :  { %v2040_v36 = vmul.f32 0.03125, %v2036_v35  ;;  %v4614_v35 = vld [vmem:[%s6616_s3 + $0x1f] ss:$0 sm:$0xff] }
 0xe1d   :  { %v2042_v37 = vsub.f32 %v6153_v29, %v2040_v36 }
 0xe1e   :  { %v2039_v38 = vpop.xlane.xlu1 %2038 }
 0xe1f   :  { %v2041_v8 = vmul.f32 0.03125, %v2039_v38  ;;  %v2044_v39 = vmul.f32 %v2042_v37, %v2042_v37 }
 0xe21   :  { %v2043_v7 = vsub.f32 %v6155_v30, %v2041_v8  ;;  %v2046_v40 = vsel %vm118_vm2, %v2044_v39, 0.0 }
 0xe22   :  { %2047 = vadd.xlane.f32.xlu1 %v2046_v40 }
 0xe23   :  { %v2045_v4 = vmul.f32 %v2043_v7, %v2043_v7 }
 0xe25   :  { %v2049_v41 = vsel %vm118_vm2, %v2045_v4, 0.0 }
 0xe26   :  { %2050 = vadd.xlane.f32.xlu1 %v2049_v41 }
 0xeaf   :  { %v2048_v49 = vpop.xlane.xlu1 %2047 }
 0xeb0   :  { %v2052_v50 = vmul.f32 0.03125, %v2048_v49 }
 0xeb2   :  { %v2054_v51 = vadd.f32 1e-05, %v2052_v50  ;;  %v2313_v50 = vld [vmem:[%s6614_s2 + $0xa0] sm:$0xff] }
 0xeb3   :  { %v2051_v52 = vpop.xlane.xlu1 %2050 }
 0xeb4   :  { %5746 = vrsqrt.f32 %v2054_v51  ;;  %v2053_v54 = vmul.f32 0.03125, %v2051_v52  ;;  %v2314_v51 = vld [vmem:[%s6614_s2 + $0xa8] sm:$0xff] }
 0xeb5   :  { %v5521_v52 = vpack.c.bf16 %v2314_v51, %v2313_v50 }
 0xeb6   :  { %v2055_v48 = vadd.f32 1e-05, %v2053_v54  ;;  %v4629_v54 = vld [vmem:[%s6617_s1 + $0x180] sm:$0xff] }
 0xeb7   :  { %5522 = vmatprep.subr.bf16.mxu1 %v5521_v52 }
 0xeb8   :  { %5748 = vrsqrt.f32 %v2055_v48  ;;  %v4630_v48 = vld [vmem:[%s6617_s1 + $0x188] sm:$0xff]  ;;  %5524 = vmatpush3.bf16.msra.mxu1 %v5521_v52 }
 0xebe   :  { %v5747_v55 = vpop.eup %5746 }
 0xebf   :  { %v2058_v57 = vmul.f32 %v5747_v55, %v2042_v37  ;;  %v5537_v55 = vpack.c.bf16 %v4630_v48, %v4629_v54 }
 0xec1   :  { %v2064_v53 = vmul.f32 %v4609_v56, %v2058_v57  ;;  %v2316_v57 = vld [vmem:[%s6614_s2 + $0xb8] sm:$0xff] }
 0xec2   :  { %v5749_v61 = vpop.eup %5748 }
 0xec3   :  { %v2059_v62 = vmul.f32 %v5749_v61, %v2043_v7  ;;  %v2070_v63 = vadd.f32 %v4610_v60, %v2064_v53  ;;  %v4631_v53 = vld [vmem:[%s6617_s1 + $0x190] sm:$0xff]  ;;  %v4632_v61 = vld [vmem:[%s6617_s1 + $0x198] sm:$0xff] }
 0xec5   :  { %v2065_v0 = vmul.f32 %v4609_v56, %v2059_v62  ;;  %5147 = vmatprep.mubr.msk.f32.mxu0 %vm118_vm2, %v2070_v63  ;;  %v2315_v56 = vld [vmem:[%s6614_s2 + $0xb0] sm:$0xff]  ;;  %v5541_v62 = vpack.c.bf16 %v4632_v61, %v4631_v53  ;;  %v4622_v63 = vld [vmem:[%s6617_s1 + $0x100] sm:$0xff] }
 0xec7   :  { %v2071_v1 = vadd.f32 %v4610_v60, %v2065_v0  ;;  %v5525_v60 = vpack.c.bf16 %v2316_v57, %v2315_v56  ;;  %v4623_v0 = vld [vmem:[%s6617_s1 + $0x108] sm:$0xff] }
 0xec9   :  { %5148 = vmatmul.mubr.msk.f32.vlgmr.msra.gmra.mrb[18].mxu0 %vm118_vm2, %v2071_v1  ;;  %5526 = vmatprep.subr.bf16.mxu1 %v5525_v60  ;;  %v5529_v1 = vpack.c.bf16 %v4623_v0, %v4622_v63 }
 0xeca   :  { %5508 = vmatpush3.bf16.msra.mxu0 %v5505_v6  ;;  %5528 = vmatpush3.bf16.msra.mxu1 %v5525_v60 }
 0xecb   :  { %5510 = vmatprep.subr.bf16.mxu0 %v5509_v11  ;;  %5530 = vmatprep.subr.bf16.mxu1 %v5529_v1 }
 0xece   :  { %5512 = vmatpush3.bf16.msra.mxu0 %v5509_v11 }
 0xecf   :  { %5514 = vmatprep.subr.bf16.mxu0 %v5513_v14 }
 0xed2   :  { %5516 = vmatpush3.bf16.msra.mxu0 %v5513_v14 }
 0xed3   :  { %5518 = vmatprep.subr.bf16.mxu0 %v5517_v17 }
 0xed6   :  { %5520 = vmatpush3.bf16.msra.mxu0 %v5517_v17 }
 0xed7   :  { %5538 = vmatprep.subr.bf16.mxu0 %v5537_v55 }
 0xf9c   :  { %v5149_v19 = vpop.f32.mrb[18].mxu0 }
 0xf9d   :  { %v2166_v20 = vadd.f32 %v5149_v19, %v4611_v18  ;;  %v2160_v21 = vpop.f32.mrb[19].mxu0 }
 0xf9e   :  { %v2161_v22 = vadd.f32 %v4611_v18, %v2160_v21  ;;  %v4625_v21 = vld [vmem:[%s6617_s1 + $0x118] sm:$0xff] }
 0xf9f   :  { %v2172_v23 = vmul.f32 0.70710677, %v2166_v20  ;;  %v2170_v28 = vmul.f32 0.5, %v2166_v20  ;;  %v4624_v20 = vld [vmem:[%s6617_s1 + $0x110] sm:$0xff] }
 0xfa0   :  { %v2171_v58 = vmul.f32 0.70710677, %v2161_v22  ;;  %v2169_v26 = vmul.f32 0.5, %v2161_v22 }
 0xfa1   :  { %5750 = verf.f32 %v2172_v23 }
 0xfa2   :  { %5752 = verf.f32 %v2171_v58  ;;  %v5533_v58 = vpack.c.bf16 %v4625_v21, %v4624_v20 }
 0xfab   :  { %v5751_v59 = vpop.eup %5750 }
 0xfac   :  { %v5753_v32 = vpop.eup %5752  ;;  %v2176_v24 = vadd.f32 1.0, %v5751_v59  ;;  %v4619_v59 = vld [vmem:[%s6616_s3 + $0x2c] ss:$0 sm:$0xff] }
 0xfad   :  { %v2175_v31 = vadd.f32 1.0, %v5753_v32  ;;  %v4633_v32 = vld [vmem:[%s6616_s3 + $0x34] ss:$0 sm:$0xff] }
 0xfae   :  { %v2178_v34 = vmul.f32 %v2176_v24, %v2170_v28  ;;  %v4650_v28 = vld [vmem:[%s6617_s1 + $0x1a8] sm:$0xff] }
 0xfaf   :  { %v2177_v33 = vmul.f32 %v2175_v31, %v2169_v26  ;;  %v4649_v31 = vld [vmem:[%s6617_s1 + $0x1a0] sm:$0xff] }
 0xfb1   :  { %5166 = vmatprep.mubr.msk.f32.mxu0 %vm2183_vm6, %v2177_v33 }
 0xfb2   :  { %5167 = vmatmul.mubr.msk.f32.vlgmr.msra.gmra.mrb[20].mxu0 %vm2183_vm6, %v2178_v34 }
 0xfb3   :  { %5540 = vmatpush3.bf16.msra.mxu0 %v5537_v55  ;;  %v4653_v55 = vld [vmem:[%s6616_s3 + $0x35] ss:$0 sm:$0xff] }
 0xfb4   :  { %5542 = vmatprep.subr.bf16.mxu0 %v5541_v62 }
 0xfb7   :  { %5544 = vmatpush3.bf16.msra.mxu0 %v5541_v62 }
0x1085   :  { %v5168_v36 = vpop.f32.mrb[20].mxu0 }
0x1086   :  { %v2256_v37 = vpop.f32.mrb[21].mxu0  ;;  %v2262_v38 = vadd.f32 %v5168_v36, %v4614_v35 }
0x1087   :  { %v2257_v8 = vadd.f32 %v4614_v35, %v2256_v37 }
0x1088   :  { %v6221_v7 = vadd.f32 %v2262_v38, %v6155_v30 }
0x1089   :  { %v6218_v39 = vadd.f32 %v2257_v8, %v6153_v29  ;;  %v5563_v8 = vpack.c.bf16 %v4650_v28, %v4649_v31  ;;  %v4670_v31 = vld [vmem:[%s6617_s1 + $0x1c8] sm:$0xff] }
0x108a   :  { %v2278_v4 = vsel %vm118_vm2, %v6221_v7, 0.0 }
0x108b   :  { %v2275_v40 = vsel %vm118_vm2, %v6218_v39, 0.0 }
0x108c   :  { %2276 = vadd.xlane.f32.xlu1 %v2275_v40 }
0x1090   :  { %2279 = vadd.xlane.f32.xlu1 %v2278_v4 }
0x1119   :  { %v2277_v41 = vpop.xlane.xlu1 %2276 }
0x111a   :  { %v2281_v42 = vmul.f32 0.03125, %v2277_v41 }
0x111c   :  { %v2283_v43 = vsub.f32 %v6218_v39, %v2281_v42  ;;  %v4626_v42 = vld [vmem:[%s6616_s3 + $0x30] ss:$0 sm:$0xff] }
0x111d   :  { %v2280_v44 = vpop.xlane.xlu1 %2279 }
0x111e   :  { %v2282_v45 = vmul.f32 0.03125, %v2280_v44  ;;  %v2285_v46 = vmul.f32 %v2283_v43, %v2283_v43 }
0x1120   :  { %v2284_v29 = vsub.f32 %v6221_v7, %v2282_v45  ;;  %v2287_v30 = vsel %vm118_vm2, %v2285_v46, 0.0  ;;  %v4651_v45 = vld [vmem:[%s6617_s1 + $0x1b0] sm:$0xff]  ;;  %v4652_v46 = vld [vmem:[%s6617_s1 + $0x1b8] sm:$0xff] }
0x1121   :  { %2288 = vadd.xlane.f32.xlu1 %v2287_v30 }
0x1122   :  { %v2286_v47 = vmul.f32 %v2284_v29, %v2284_v29 }
0x1124   :  { %v2290_v49 = vsel %vm118_vm2, %v2286_v47, 0.0  ;;  %v5567_v47 = vpack.c.bf16 %v4652_v46, %v4651_v45  ;;  %v6383_v45 = vld [vmem:[%s6616_s3 + $0x38] sm:$0xff] }
0x1125   :  { %2291 = vadd.xlane.f32.xlu0 %v2290_v49 }
0x11ae   :  { %v2289_v3 = vpop.xlane.xlu1 %2288 }
0x11af   :  { %v2293_v5 = vmul.f32 0.03125, %v2289_v3 }
0x11b1   :  { %v2295_v6 = vadd.f32 1e-05, %v2293_v5 }
0x11b2   :  { %v2292_v9 = vpop.xlane.xlu0 %2291 }
0x11b3   :  { %5754 = vrsqrt.f32 %v2295_v6  ;;  %v2294_v10 = vmul.f32 0.03125, %v2292_v9 }
0x11b5   :  { %v2296_v11 = vadd.f32 1e-05, %v2294_v10  ;;  %v4642_v10 = vld [vmem:[%s6617_s1 + $0x120] sm:$0xff] }
0x11b7   :  { %5756 = vrsqrt.f32 %v2296_v11  ;;  %v4643_v11 = vld [vmem:[%s6617_s1 + $0x128] sm:$0xff] }
0x11bd   :  { %v5755_v12 = vpop.eup %5754 }
0x11be   :  { %v2299_v14 = vmul.f32 %v5755_v12, %v2283_v43  ;;  %v5555_v12 = vpack.c.bf16 %v4643_v11, %v4642_v10 }
0x11c0   :  { %v2305_v16 = vmul.f32 %v4617_v13, %v2299_v14 }
0x11c1   :  { %v5757_v17 = vpop.eup %5756 }
0x11c2   :  { %v6267_v18 = vadd.f32 %v4618_v15, %v2305_v16  ;;  %v2300_v19 = vmul.f32 %v5757_v17, %v2284_v29  ;;  %v4644_v16 = vld [vmem:[%s6617_s1 + $0x130] sm:$0xff]  ;;  %v4645_v17 = vld [vmem:[%s6617_s1 + $0x138] sm:$0xff] }
0x11c4   :  { %v2306_v22 = vmul.f32 %v4617_v13, %v2300_v19  ;;  %5177 = vmatprep.mubr.msk.f32.mxu1 %vm118_vm2, %v6267_v18  ;;  %5199 = vmatprep.mubr.msk.f32.mxu0 %vm118_vm2, %v6267_v18 }
0x11c6   :  { %v6279_v23 = vadd.f32 %v4618_v15, %v2306_v22 }
0x11c8   :  { %5178 = vmatmul.mubr.msk.f32.vlgmr.msra.gmra.mrb[20].mxu1 %vm118_vm2, %v6279_v23  ;;  %5200 = vmatmul.mubr.msk.f32.vlgmr.msra.gmra.mrb[22].mxu0 %vm118_vm2, %v6279_v23 }
0x11c9   :  { %5532 = vmatpush3.bf16.msra.mxu1 %v5529_v1  ;;  %5188 = vmatprep.mubr.msk.f32.mxu1 %vm118_vm2, %v6267_v18 }
0x11ca   :  { %5534 = vmatprep.subr.bf16.mxu1 %v5533_v58 }
0x11cd   :  { %5536 = vmatpush3.bf16.msra.mxu1 %v5533_v58  ;;  %v5559_v58 = vpack.c.bf16 %v4645_v17, %v4644_v16 }
0x11d0   :  { %5189 = vmatmul.mubr.msk.f32.vlgmr.msra.gmra.mrb[22].mxu1 %vm118_vm2, %v6279_v23 }
0x129b   :  { %v5179_v24 = vpop.f32.mrb[20].mxu1  ;;  %v5201_v26 = vpop.f32.mrb[22].mxu0 }
0x129c   :  { %v2399_v33 = vadd.f32 %v5179_v24, %v4619_v59  ;;  %v2569_v34 = vadd.f32 %v5201_v26, %v4633_v32  ;;  %v2393_v35 = vpop.f32.mrb[21].mxu1  ;;  %v2563_v36 = vpop.f32.mrb[23].mxu0  ;;  %v4669_v26 = vld [vmem:[%s6617_s1 + $0x1c0] sm:$0xff] }
0x129d   :  { %v2394_v37 = vadd.f32 %v4619_v59, %v2393_v35  ;;  %v2564_v38 = vadd.f32 %v4633_v32, %v2563_v36  ;;  %v5589_v28 = vpack.c.bf16 %v4670_v31, %v4669_v26  ;;  %v4646_v35 = vld [vmem:[%s6616_s3 + $0x31] ss:$0 sm:$0xff]  ;;  %v4666_v26 = vld [vmem:[%s6616_s3 + $0x32] ss:$0 sm:$0xff] }
0x129f   :  { %v5551_v40 = vpack.c.bf16 %v2569_v34, %v2564_v38  ;;  %v5545_v4 = vpack.c.bf16 %v2399_v33, %v2394_v37  ;;  %v6301_v41 = vpack.i.bf16 %v2399_v33, %v2394_v37  ;;  %v4671_v37 = vld [vmem:[%s6617_s1 + $0x1d0] sm:$0xff]  ;;  %v4672_v38 = vld [vmem:[%s6617_s1 + $0x1d8] sm:$0xff] }
0x12a1   :  { %5547 = vmatprep.subr.msk.bf16.mxu1 %vm5927_vm4, %v5545_v4  ;;  %5552 = vmatprep.subr.bf16.mxu0 %v5551_v40 }
0x12a2   :  { %5550 = vmatpush3.bf16.xpose.msk.msra.mxu1 %vm5927_vm4, %v5545_v4  ;;  %5554 = vmatpush3.bf16.msra.mxu0 %v5551_v40 }
0x12a3   :  { %v5190_v43 = vpop.f32.mrb[22].mxu1  ;;  %5564 = vmatprep.subr.bf16.mxu1 %v5563_v8  ;;  %5556 = vmatprep.subr.bf16.mxu0 %v5555_v12 }
0x12a4   :  { %v2479_v44 = vpop.f32.mrb[23].mxu1  ;;  %v2485_v30 = vadd.f32 %v5190_v43, %v4626_v42 }
0x12a5   :  { %v2480_v29 = vadd.f32 %v4626_v42, %v2479_v44  ;;  %v5593_v42 = vpack.c.bf16 %v4672_v38, %v4671_v37 }
0x12a7   :  { %5206 = vmatprep.mubr.msk.f32.mxu1 %vm416_vm3, %v2480_v29  ;;  %v6389_v29 = vld [vmem:[%s6616_s3 + $0x40] sm:$0xff] }
0x12a9   :  { %5207 = vmatmul.mubr.msk.f32.vlgmr.msra.gmra.mrb[24].mxu1 %vm416_vm3, %v2485_v30 }
0x12aa   :  { %5566 = vmatpush3.bf16.msra.mxu1 %v5563_v8  ;;  %5235 = vmatprep.mubr.msk.f32.mxu1 %vm118_vm2, %v6267_v18 }
0x12ab   :  { %5568 = vmatprep.subr.bf16.mxu1 %v5567_v47 }
0x12ae   :  { %5570 = vmatpush3.bf16.msra.mxu1 %v5567_v47 }
0x12b1   :  { %5236 = vmatmul.mubr.msk.f32.vlgmr.msra.gmra.mrb[26].mxu1 %vm118_vm2, %v6279_v23 }
0x137c   :  { %v5208_v49 = vpop.f32.mrb[24].mxu1 }
0x137d   :  { %v2656_v50 = vadd.f32 %v5208_v49, %v5972_v27  ;;  %v2650_v51 = vpop.f32.mrb[25].mxu1  ;;  %v4673_v49 = vld [vmem:[%s6616_s3 + $0x36] ss:$0 sm:$0xff] }
0x137e   :  { %v2651_v52 = vadd.f32 %v2650_v51, %v5967_v25 }
0x137f   :  { %v2662_v54 = vsel %vm504_vm5, %v2656_v50, -inf }
0x1380   :  { %2663 = vmax.xlane.f32.xlu0 %v2662_v54  ;;  %v2659_v48 = vsel %vm504_vm5, %v2651_v52, -inf }
0x1381   :  { %2660 = vmax.xlane.f32.xlu1 %v2659_v48 }
0x1384   :  { %v5237_v56 = vpop.f32.mrb[26].mxu1 }
0x1385   :  { %v2929_v57 = vadd.f32 %v5237_v56, %v4653_v55  ;;  %v2923_v60 = vpop.f32.mrb[27].mxu1 }
0x1386   :  { %v2924_v53 = vadd.f32 %v4653_v55, %v2923_v60 }
0x1388   :  { %v5577_v61 = vpack.c.bf16 %v2929_v57, %v2924_v53 }
0x138a   :  { %5578 = vmatprep.subr.bf16.mxu1 %v5577_v61 }
0x138b   :  { %5580 = vmatpush3.bf16.msra.mxu1 %v5577_v61 }
0x140d   :  { %v2664_v27 = vpop.xlane.xlu0 %2663 }
0x140e   :  { %v2666_v62 = vsub.f32 %v2656_v50, %v2664_v27  ;;  %v2661_v25 = vpop.xlane.xlu1 %2660 }
0x140f   :  { %v2665_v63 = vsub.f32 %v2651_v52, %v2661_v25 }
0x1410   :  { %v2669_v0 = vmul.f32 1.442695, %v2666_v62 }
0x1411   :  { %v2667_v1 = vmul.f32 1.442695, %v2665_v63 }
0x1412   :  { %5758 = vpow2.f32 %v2669_v0 }
0x1413   :  { %5760 = vpow2.f32 %v2667_v1  ;;  %v4662_v1 = vld [vmem:[%s6617_s1 + $0x140] sm:$0xff] }
0x141c   :  { %v5759_v3 = vpop.eup %5758 }
0x141d   :  { %v5761_v5 = vpop.eup %5760  ;;  %v2674_v6 = vsel %vm504_vm5, %v5759_v3, 0.0 }
0x141e   :  { %2675 = vadd.xlane.f32.xlu0 %v2674_v6  ;;  %v2671_v9 = vsel %vm504_vm5, %v5761_v5, 0.0 }
0x141f   :  { %2672 = vadd.xlane.f32.xlu1 %v2671_v9 }
0x1430   :  { %5696 = vrot.lane.b32.xlu1 %v6301_v41, %s5800_s7 }
0x14ab   :  { %v2676_v13 = vpop.xlane.xlu0 %2675 }
0x14ac   :  { %5762 = vrcp.f32 %v2676_v13  ;;  %v2673_v14 = vpop.xlane.xlu1 %2672  ;;  %v4665_v13 = vld [vmem:[%s6617_s1 + $0x158] sm:$0xff] }
0x14ad   :  { %5764 = vrcp.f32 %v2673_v14 }
0x14b0   :  { %v5697_v20 = vpop.permute.xlu1 %5696 }
0x14b1   :  { %v5699_v59 = vunpack.i.h.bf16 %v5697_v20  ;;  %v5698_v32 = vunpack.i.l.bf16 %v5697_v20 }
0x14b3   :  { %v5571_v24 = vpack.c.bf16 %v5699_v59, %v5698_v32 }
0x14b6   :  { %v5763_v15 = vpop.eup %5762 }
0x14b7   :  { %v5765_v19 = vpop.eup %5764  ;;  %v2680_v22 = vmul.f32 %v5763_v15, %v5759_v3  ;;  %v4663_v3 = vld [vmem:[%s6617_s1 + $0x148] sm:$0xff] }
0x14b8   :  { %v2679_v21 = vmul.f32 %v5765_v19, %v5761_v5  ;;  %v5581_v5 = vpack.c.bf16 %v4663_v3, %v4662_v1 }
0x14ba   :  { %5213 = vmatprep.mubr.msk.f32.mxu0 %vm504_vm5, %v2679_v21  ;;  %5582 = vmatprep.subr.bf16.mxu1 %v5581_v5 }
0x14bb   :  { %5214 = vmatmul.mubr.msk.f32.vlgmr.msra.gmra.mrb[24].mxu0 %vm504_vm5, %v2680_v22  ;;  %v4689_v22 = vld [vmem:[%s6617_s1 + $0x1e0] sm:$0xff] }
0x14bc   :  { %5558 = vmatpush3.bf16.msra.mxu0 %v5555_v12  ;;  %5224 = vmatprep.mubr.msk.f32.mxu0 %vm118_vm2, %v6267_v18  ;;  %v4664_v12 = vld [vmem:[%s6617_s1 + $0x150] sm:$0xff] }
0x14bd   :  { %5560 = vmatprep.subr.bf16.mxu0 %v5559_v58  ;;  %v5585_v17 = vpack.c.bf16 %v4665_v13, %v4664_v12 }
0x14c0   :  { %5562 = vmatpush3.bf16.msra.mxu0 %v5559_v58  ;;  %v4690_v58 = vld [vmem:[%s6617_s1 + $0x1e8] sm:$0xff] }
0x14c1   :  { %5573 = vmatprep.subr.msk.bf16.mxu0 %vm5927_vm4, %v5571_v24  ;;  %v5615_v59 = vpack.c.bf16 %v4690_v58, %v4689_v22 }
0x14c3   :  { %5225 = vmatmul.mubr.msk.f32.vlgmr.msra.gmra.mrb[26].mxu0 %vm118_vm2, %v6279_v23 }
0x14c9   :  { %5576 = vmatpush3.bf16.xpose.msk.msra.mxu0 %vm5927_vm4, %v5571_v24 }
0x14ca   :  { %5590 = vmatprep.subr.bf16.mxu0 %v5589_v28 }
0x158e   :  { %v6361_v33 = vpop.f32.mrb[24].mxu0 }
0x158f   :  { %v6363_v34 = vpop.f32.mrb[25].mxu0 }
0x1596   :  { %v5226_v36 = vpop.f32.mrb[26].mxu0 }
0x1597   :  { %v2839_v8 = vpop.f32.mrb[27].mxu0  ;;  %v2845_v4 = vadd.f32 %v5226_v36, %v4646_v35 }
0x1598   :  { %v2840_v40 = vadd.f32 %v4646_v35, %v2839_v8  ;;  %v4692_v35 = vld [vmem:[%s6617_s1 + $0x1f8] sm:$0xff] }
0x159a   :  { %5242 = vmatprep.mubr.msk.f32.mxu0 %vm416_vm3, %v2840_v40 }
0x159b   :  { %5243 = vmatmul.mubr.msk.f32.vlgmr.msra.gmra.mrb[28].mxu0 %vm416_vm3, %v2845_v4 }
0x159c   :  { %5592 = vmatpush3.bf16.msra.mxu0 %v5589_v28  ;;  %5271 = vmatprep.mubr.msk.f32.mxu0 %vm118_vm2, %v6267_v18  ;;  %v4691_v28 = vld [vmem:[%s6617_s1 + $0x1f0] sm:$0xff] }
0x159d   :  { %5594 = vmatprep.subr.bf16.mxu0 %v5593_v42  ;;  %v5619_v8 = vpack.c.bf16 %v4692_v35, %v4691_v28 }
0x15a0   :  { %5596 = vmatpush3.bf16.msra.mxu0 %v5593_v42 }
0x15a3   :  { %5272 = vmatmul.mubr.msk.f32.vlgmr.msra.gmra.mrb[30].mxu0 %vm118_vm2, %v6279_v23 }
0x166e   :  { %v5244_v43 = vpop.f32.mrb[28].mxu0 }
0x166f   :  { %v3012_v44 = vpop.f32.mrb[29].mxu0  ;;  %v3018_v30 = vadd.f32 %v6389_v29, %v5244_v43 }
0x1670   :  { %v3013_v46 = vadd.f32 %v6383_v45, %v3012_v44 }
0x1671   :  { %v3024_v51 = vsel %vm504_vm5, %v3018_v30, -inf }
0x1672   :  { %v3021_v47 = vsel %vm504_vm5, %v3013_v46, -inf }
0x1673   :  { %3022 = vmax.xlane.f32.xlu0 %v3021_v47 }
0x1676   :  { %v5273_v50 = vpop.f32.mrb[30].mxu0 }
0x1677   :  { %v3291_v52 = vadd.f32 %v5273_v50, %v4673_v49  ;;  %v3285_v54 = vpop.f32.mrb[31].mxu0  ;;  %3025 = vmax.xlane.f32.xlu0 %v3024_v51 }
0x1678   :  { %v3286_v48 = vadd.f32 %v4673_v49, %v3285_v54 }
0x167a   :  { %v5603_v55 = vpack.c.bf16 %v3291_v52, %v3286_v48 }
0x167c   :  { %5604 = vmatprep.subr.bf16.mxu0 %v5603_v55 }
0x167d   :  { %5606 = vmatpush3.bf16.msra.mxu0 %v5603_v55 }
0x1700   :  { %v3023_v56 = vpop.xlane.xlu0 %3022 }
0x1701   :  { %v3027_v57 = vsub.f32 %v3013_v46, %v3023_v56 }
0x1703   :  { %v3029_v60 = vmul.f32 1.442695, %v3027_v57 }
0x1704   :  { %v3026_v53 = vpop.xlane.xlu0 %3025 }
0x1705   :  { %5766 = vpow2.f32 %v3029_v60  ;;  %v3028_v61 = vsub.f32 %v3018_v30, %v3026_v53  ;;  %v4693_v30 = vld [vmem:[%s6616_s3 + $0x37] ss:$0 sm:$0xff] }
0x1707   :  { %v3031_v27 = vmul.f32 1.442695, %v3028_v61 }
0x1709   :  { %5768 = vpow2.f32 %v3031_v27 }
0x170f   :  { %v5767_v62 = vpop.eup %5766 }
0x1710   :  { %v3033_v25 = vsel %vm504_vm5, %v5767_v62, 0.0 }
0x1711   :  { %3034 = vadd.xlane.f32.xlu0 %v3033_v25  ;;  %v4682_v25 = vld [vmem:[%s6617_s1 + $0x160] sm:$0xff] }
0x1713   :  { %v5769_v63 = vpop.eup %5768 }
0x1714   :  { %v3036_v0 = vsel %vm504_vm5, %v5769_v63, 0.0 }
0x1715   :  { %3037 = vadd.xlane.f32.xlu0 %v3036_v0 }
0x172b   :  { %5701 = vrot.lane.b32.xlu0 %v6301_v41, %s5801_s12 }
0x179e   :  { %v3035_v6 = vpop.xlane.xlu0 %3034 }
0x179f   :  { %5770 = vrcp.f32 %v3035_v6 }
0x17a2   :  { %v3038_v9 = vpop.xlane.xlu0 %3037 }
0x17a3   :  { %5772 = vrcp.f32 %v3038_v9  ;;  %v4685_v9 = vld [vmem:[%s6617_s1 + $0x178] sm:$0xff] }
0x17a6   :  { %v5702_v15 = vpop.permute.xlu0 %5701 }
0x17a7   :  { %v5704_v19 = vunpack.i.h.bf16 %v5702_v15  ;;  %v5703_v20 = vunpack.i.l.bf16 %v5702_v15 }
0x17a9   :  { %v5771_v10 = vpop.eup %5770  ;;  %v5597_v21 = vpack.c.bf16 %v5704_v19, %v5703_v20  ;;  %v4686_v20 = vld [vmem:[%s6616_s3 + $0x33] ss:$0 sm:$0xff] }
0x17aa   :  { %v3041_v11 = vmul.f32 %v5771_v10, %v5767_v62 }
0x17ac   :  { %5249 = vmatprep.mubr.msk.f32.mxu1 %vm504_vm5, %v3041_v11 }
0x17ad   :  { %v5773_v14 = vpop.eup %5772 }
0x17ae   :  { %v3042_v16 = vmul.f32 %v5773_v14, %v5769_v63  ;;  %v4683_v63 = vld [vmem:[%s6617_s1 + $0x168] sm:$0xff] }
0x17af   :  { %v5607_v0 = vpack.c.bf16 %v4683_v63, %v4682_v25 }
0x17b0   :  { %5250 = vmatmul.mubr.msk.f32.vlgmr.msra.gmra.mrb[28].mxu1 %vm504_vm5, %v3042_v16 }
0x17b1   :  { %5584 = vmatpush3.bf16.msra.mxu1 %v5581_v5  ;;  %5260 = vmatprep.mubr.msk.f32.mxu1 %vm118_vm2, %v6267_v18 }
0x17b2   :  { %5586 = vmatprep.subr.bf16.mxu1 %v5585_v17  ;;  %5608 = vmatprep.subr.bf16.mxu0 %v5607_v0 }
0x17b5   :  { %5588 = vmatpush3.bf16.msra.mxu1 %v5585_v17 }
0x17b6   :  { %5599 = vmatprep.subr.msk.bf16.mxu1 %vm5927_vm4, %v5597_v21 }
0x17b8   :  { %5261 = vmatmul.mubr.msk.f32.vlgmr.msra.gmra.mrb[30].mxu1 %vm118_vm2, %v6279_v23 }
0x17be   :  { %5602 = vmatpush3.bf16.xpose.msk.msra.mxu1 %vm5927_vm4, %v5597_v21 }
0x17bf   :  { %5616 = vmatprep.subr.bf16.mxu1 %v5615_v59 }
0x1883   :  { %v6429_v32 = vpop.f32.mrb[28].mxu1 }
0x1884   :  { %v6431_v24 = vpop.f32.mrb[29].mxu1 }
0x188b   :  { %v5262_v31 = vpop.f32.mrb[30].mxu1 }
0x188c   :  { %v3201_v36 = vpop.f32.mrb[31].mxu1  ;;  %v3207_v38 = vadd.f32 %v5262_v31, %v4666_v26 }
0x188d   :  { %v3202_v37 = vadd.f32 %v4666_v26, %v3201_v36 }
0x188f   :  { %5278 = vmatprep.mubr.msk.f32.mxu1 %vm416_vm3, %v3202_v37 }
0x1890   :  { %5279 = vmatmul.mubr.msk.f32.vlgmr.msra.gmra.mrb[32].mxu1 %vm416_vm3, %v3207_v38 }
0x1891   :  { %5618 = vmatpush3.bf16.msra.mxu1 %v5615_v59  ;;  %5307 = vmatprep.mubr.msk.f32.mxu1 %vm118_vm2, %v6267_v18 }
0x1892   :  { %5620 = vmatprep.subr.bf16.mxu1 %v5619_v8 }
0x1895   :  { %5622 = vmatpush3.bf16.msra.mxu1 %v5619_v8 }
0x1898   :  { %5308 = vmatmul.mubr.msk.f32.vlgmr.msra.gmra.mrb[34].mxu1 %vm118_vm2, %v6279_v23 }
0x1963   :  { %v5280_v40 = vpop.f32.mrb[32].mxu1 }
0x1964   :  { %v3380_v4 = vadd.f32 %v6389_v29, %v5280_v40  ;;  %v3374_v42 = vpop.f32.mrb[33].mxu1 }
0x1965   :  { %v3375_v43 = vadd.f32 %v6383_v45, %v3374_v42 }
0x1966   :  { %v3386_v44 = vsel %vm504_vm5, %v3380_v4, -inf }
0x1967   :  { %3387 = vmax.xlane.f32.xlu0 %v3386_v44  ;;  %v3383_v46 = vsel %vm504_vm5, %v3375_v43, -inf }
0x1968   :  { %3384 = vmax.xlane.f32.xlu1 %v3383_v46 }
0x196b   :  { %v5309_v47 = vpop.f32.mrb[34].mxu1 }
0x196c   :  { %v3653_v49 = vadd.f32 %v5309_v47, %v4693_v30  ;;  %v3647_v50 = vpop.f32.mrb[35].mxu1 }
0x196d   :  { %v3648_v51 = vadd.f32 %v4693_v30, %v3647_v50 }
0x196f   :  { %v5629_v52 = vpack.c.bf16 %v3653_v49, %v3648_v51  ;;  %v3848_v51 = vld [vmem:[%s6614_s2 + $0xc0] sm:$0xff] }
0x1971   :  { %5630 = vmatprep.subr.bf16.mxu1 %v5629_v52 }
0x1972   :  { %5632 = vmatpush3.bf16.msra.mxu1 %v5629_v52  ;;  %v3850_v52 = vld [vmem:[%s6614_s2 + $0xd0] sm:$0xff] }
0x19f4   :  { %v3388_v54 = vpop.xlane.xlu0 %3387 }
0x19f5   :  { %v3390_v48 = vsub.f32 %v3380_v4, %v3388_v54  ;;  %v3385_v55 = vpop.xlane.xlu1 %3384  ;;  %v3851_v54 = vld [vmem:[%s6614_s2 + $0xd8] sm:$0xff] }
0x19f6   :  { %v3389_v56 = vsub.f32 %v3375_v43, %v3385_v55  ;;  %v3849_v43 = vld [vmem:[%s6614_s2 + $0xc8] sm:$0xff] }
0x19f7   :  { %v3393_v57 = vmul.f32 1.442695, %v3390_v48  ;;  %5324 = vmatprep.subr.mxu1 %v3849_v43  ;;  %v4710_v48 = vld [vmem:[%s6616_s3 + $0x2d] ss:$0 sm:$0xff] }
0x19f8   :  { %v3391_v60 = vmul.f32 1.442695, %v3389_v56 }
0x19fa   :  { %5774 = vpow2.f32 %v3391_v60 }
0x19fb   :  { %5776 = vpow2.f32 %v3393_v57 }
0x1a04   :  { %v5775_v53 = vpop.eup %5774 }
0x1a05   :  { %v3395_v61 = vsel %vm504_vm5, %v5775_v53, 0.0  ;;  %v5777_v27 = vpop.eup %5776 }
0x1a06   :  { %3396 = vadd.xlane.f32.xlu1 %v3395_v61  ;;  %v3398_v62 = vsel %vm504_vm5, %v5777_v27, 0.0 }
0x1a0a   :  { %3399 = vadd.xlane.f32.xlu1 %v3398_v62 }
0x1a1b   :  { %5706 = vrot.lane.b32.xlu1 %v6301_v41, %s5802_s9  ;;  %v4684_v41 = vld [vmem:[%s6617_s1 + $0x170] sm:$0xff] }
0x1a1c   :  { %v5611_v13 = vpack.c.bf16 %v4685_v9, %v4684_v41  ;;  %v4227_v41 = vld [vmem:[%s6614_s2 + $0xe8] sm:$0xff] }
0x1a93   :  { %v3397_v1 = vpop.xlane.xlu1 %3396 }
0x1a94   :  { %5778 = vrcp.f32 %v3397_v1 }
0x1a97   :  { %v3400_v3 = vpop.xlane.xlu1 %3399 }
0x1a98   :  { %5780 = vrcp.f32 %v3400_v3 }
0x1a9b   :  { %v5707_v11 = vpop.permute.xlu1 %5706 }
0x1a9c   :  { %v5709_v14 = vunpack.i.h.bf16 %v5707_v11  ;;  %v5708_v15 = vunpack.i.l.bf16 %v5707_v11  ;;  %v4229_v11 = vld [vmem:[%s6614_s2 + $0xf8] sm:$0xff] }
0x1a9e   :  { %v5779_v5 = vpop.eup %5778  ;;  %v5623_v16 = vpack.c.bf16 %v5709_v14, %v5708_v15 }
0x1a9f   :  { %v3403_v6 = vmul.f32 %v5779_v5, %v5775_v53 }
0x1aa1   :  { %5285 = vmatprep.mubr.msk.f32.mxu0 %vm504_vm5, %v3403_v6  ;;  %v4226_v6 = vld [vmem:[%s6614_s2 + $0xe0] sm:$0xff] }
0x1aa2   :  { %v5781_v10 = vpop.eup %5780  ;;  %v5633_v9 = vpack.c.bf16 %v4227_v41, %v4226_v6  ;;  %v4719_v6 = vld [vmem:[%s6616_s3 + $0x10] ss:$0 sm:$0xff] }
0x1aa3   :  { %v3404_v12 = vmul.f32 %v5781_v10, %v5777_v27  ;;  %v4228_v10 = vld [vmem:[%s6614_s2 + $0xf0] sm:$0xff] }
0x1aa5   :  { %5286 = vmatmul.mubr.msk.f32.vlgmr.msra.gmra.mrb[32].mxu0 %vm504_vm5, %v3404_v12  ;;  %v5637_v12 = vpack.c.bf16 %v4229_v11, %v4228_v10 }
0x1aa6   :  { %5610 = vmatpush3.bf16.msra.mxu0 %v5607_v0  ;;  %5296 = vmatprep.mubr.msk.f32.mxu0 %vm118_vm2, %v6267_v18 }
0x1aa7   :  { %5612 = vmatprep.subr.bf16.mxu0 %v5611_v13 }
0x1aaa   :  { %5614 = vmatpush3.bf16.msra.mxu0 %v5611_v13 }
0x1aab   :  { %5625 = vmatprep.subr.msk.bf16.mxu0 %vm5927_vm4, %v5623_v16 }
0x1aad   :  { %5297 = vmatmul.mubr.msk.f32.vlgmr.msra.gmra.mrb[34].mxu0 %vm118_vm2, %v6279_v23 }
0x1ab3   :  { %5628 = vmatpush3.bf16.xpose.msk.msra.mxu0 %vm5927_vm4, %v5623_v16 }
0x1ab4   :  { %5634 = vmatprep.subr.bf16.mxu0 %v5633_v9 }
0x1b78   :  { %v5287_v17 = vpop.f32.mrb[32].mxu0 }
0x1b79   :  { %v3477_v19 = vpop.f32.mrb[33].mxu0 }
0x1b80   :  { %v5298_v21 = vpop.f32.mrb[34].mxu0 }
0x1b81   :  { %v3563_v18 = vpop.f32.mrb[35].mxu0  ;;  %v3569_v58 = vadd.f32 %v5298_v21, %v4686_v20  ;;  %v4711_v21 = vld [vmem:[%s6616_s3 + $0x2a] ss:$0 sm:$0xff] }
0x1b82   :  { %v3564_v22 = vadd.f32 %v4686_v20, %v3563_v18 }
0x1b84   :  { %5314 = vmatprep.mubr.msk.f32.mxu0 %vm416_vm3, %v3564_v22  ;;  %v4712_v22 = vld [vmem:[%s6616_s3 + $0x2b] ss:$0 sm:$0xff] }
0x1b85   :  { %5315 = vmatmul.mubr.msk.f32.vlgmr.msra.gmra.mrb[36].mxu0 %vm416_vm3, %v3569_v58 }
0x1b86   :  { %5636 = vmatpush3.bf16.msra.mxu0 %v5633_v9 }
0x1b87   :  { %5638 = vmatprep.subr.bf16.mxu0 %v5637_v12 }
0x1b8a   :  { %5640 = vmatpush3.bf16.msra.mxu0 %v5637_v12 }
0x1c58   :  { %v5316_v59 = vpop.f32.mrb[36].mxu0 }
0x1c59   :  { %v3736_v26 = vpop.f32.mrb[37].mxu0  ;;  %v3742_v2 = vadd.f32 %v6389_v29, %v5316_v59 }
0x1c5a   :  { %v3737_v23 = vadd.f32 %v6383_v45, %v3736_v26 }
0x1c5b   :  { %v3748_v28 = vsel %vm504_vm5, %v3742_v2, -inf }
0x1c5c   :  { %v3745_v31 = vsel %vm504_vm5, %v3737_v23, -inf }
0x1c5d   :  { %3746 = vmax.xlane.f32.xlu0 %v3745_v31 }
0x1c61   :  { %3749 = vmax.xlane.f32.xlu0 %v3748_v28  ;;  %v4230_v28 = vld [vmem:[%s6614_s2 + $0x100] sm:$0xff] }
0x1cea   :  { %v3747_v35 = vpop.xlane.xlu0 %3746 }
0x1ceb   :  { %v3751_v36 = vsub.f32 %v3737_v23, %v3747_v35  ;;  %v4231_v35 = vld [vmem:[%s6614_s2 + $0x108] sm:$0xff] }
0x1ced   :  { %v3753_v37 = vmul.f32 1.442695, %v3751_v36  ;;  %v5641_v36 = vpack.c.bf16 %v4231_v35, %v4230_v28 }
0x1cee   :  { %v3750_v38 = vpop.xlane.xlu0 %3749 }
0x1cef   :  { %5782 = vpow2.f32 %v3753_v37  ;;  %v3752_v8 = vsub.f32 %v3742_v2, %v3750_v38  ;;  %5642 = vmatprep.subr.bf16.mxu0 %v5641_v36  ;;  %v4232_v37 = vld [vmem:[%s6614_s2 + $0x110] sm:$0xff]  ;;  %v4233_v38 = vld [vmem:[%s6614_s2 + $0x118] sm:$0xff] }
0x1cf1   :  { %v3755_v40 = vmul.f32 1.442695, %v3752_v8  ;;  %v5645_v8 = vpack.c.bf16 %v4233_v38, %v4232_v37 }
0x1cf3   :  { %5784 = vpow2.f32 %v3755_v40  ;;  %v4234_v40 = vld [vmem:[%s6614_s2 + $0x120] sm:$0xff] }
0x1cf9   :  { %v5783_v4 = vpop.eup %5782 }
0x1cfa   :  { %v3757_v42 = vsel %vm504_vm5, %v5783_v4, 0.0 }
0x1cfb   :  { %3758 = vadd.xlane.f32.xlu0 %v3757_v42 }
0x1cfd   :  { %v5785_v45 = vpop.eup %5784 }
0x1cfe   :  { %v3760_v29 = vsel %vm504_vm5, %v5785_v45, 0.0 }
0x1cff   :  { %3761 = vadd.xlane.f32.xlu1 %v3760_v29  ;;  %v4237_v29 = vld [vmem:[%s6614_s2 + $0x138] sm:$0xff] }
0x1d88   :  { %v3759_v44 = vpop.xlane.xlu0 %3758 }
0x1d89   :  { %5786 = vrcp.f32 %v3759_v44  ;;  %v4420_v44 = vld [vmem:[%s6614_s2 + $0x148] sm:$0xff] }
0x1d8c   :  { %v3762_v46 = vpop.xlane.xlu1 %3761 }
0x1d8d   :  { %5788 = vrcp.f32 %v3762_v46  ;;  %v4421_v46 = vld [vmem:[%s6614_s2 + $0x150] sm:$0xff] }
0x1d93   :  { %v5787_v30 = vpop.eup %5786 }
0x1d94   :  { %v3765_v47 = vmul.f32 %v5787_v30, %v5783_v4  ;;  %v4235_v4 = vld [vmem:[%s6614_s2 + $0x128] sm:$0xff]  ;;  %v5657_v30 = vpack.c.bf16 %v4421_v46, %v4420_v44 }
0x1d95   :  { %v5649_v42 = vpack.c.bf16 %v4235_v4, %v4234_v40 }
0x1d96   :  { %5321 = vmatprep.mubr.msk.f32.mxu1 %vm504_vm5, %v3765_v47  ;;  %v4713_v47 = vld [vmem:[%s6616_s3 + $0x2e] ss:$0 sm:$0xff] }
0x1d97   :  { %v5789_v49 = vpop.eup %5788 }
0x1d98   :  { %v3766_v50 = vmul.f32 %v5789_v49, %v5785_v45  ;;  %v4236_v45 = vld [vmem:[%s6614_s2 + $0x130] sm:$0xff] }
0x1d9a   :  { %5322 = vmatmul.mubr.msk.f32.vlgmr.msra.gmra.mrb[36].mxu1 %vm504_vm5, %v3766_v50 }
0x1d9b   :  { %5326 = vmatprep.mubr.msk.f32.mxu1 %vm416_vm3, %v6431_v24  ;;  %5325 = vmatpush3.msra.mxu1 %v3849_v43  ;;  %v5653_v43 = vpack.c.bf16 %v4237_v29, %v4236_v45 }
0x1d9c   :  { %5329 = vmatprep.subr.mxu1 %v3848_v51 }
0x1d9e   :  { %5327 = vmatmul.mubr.msk.f32.vlgmr.msra.gmra.mrb[38].mxu1 %vm416_vm3, %v6429_v32 }
0x1d9f   :  { %5331 = vmatprep.mubr.msk.f32.mxu1 %vm416_vm3, %v6363_v34  ;;  %5330 = vmatpush3.msra.mxu1 %v3848_v51 }
0x1da0   :  { %5334 = vmatprep.subr.mxu1 %v3850_v52 }
0x1da6   :  { %5332 = vmatmul.mubr.msk.f32.vlgmr.msra.gmra.mrb[38].mxu1 %vm416_vm3, %v6361_v33 }
0x1da7   :  { %5336 = vmatprep.mubr.msk.f32.mxu1 %vm416_vm3, %v3477_v19  ;;  %5335 = vmatpush3.msra.mxu1 %v3850_v52 }
0x1da8   :  { %5339 = vmatprep.subr.mxu1 %v3851_v54 }
0x1dae   :  { %5337 = vmatmul.mubr.msk.f32.vlgmr.msra.gmra.mrb[38].mxu1 %vm416_vm3, %v5287_v17 }
0x1daf   :  { %5340 = vmatpush3.msra.mxu1 %v3851_v54 }
0x1db0   :  { %5658 = vmatprep.subr.bf16.mxu1 %v5657_v30 }
0x1e6d   :  { %v5323_v32 = vpop.f32.mrb[36].mxu1 }
0x1e6e   :  { %v3839_v24 = vpop.f32.mrb[37].mxu1 }
0x1e6f   :  { %5341 = vmatprep.mubr.msk.f32.mxu1 %vm416_vm3, %v3839_v24 }
0x1e70   :  { %5342 = vmatmul.mubr.msk.f32.vlgmr.msra.gmra.mrb[38].mxu1 %vm416_vm3, %v5323_v32 }
0x1e71   :  { %5660 = vmatpush3.bf16.msra.mxu1 %v5657_v30 }
0x1f43   :  { %v5343_v34 = vpop.f32.mrb[38].mxu1 }
0x1f44   :  { %v4169_v55 = vpop.f32.mrb[39].mxu1  ;;  %v4181_v33 = vadd.f32 %v5343_v34, %v6221_v7 }
0x1f45   :  { %v4180_v56 = vadd.f32 %v4169_v55, %v6218_v39 }
0x1f46   :  { %v6525_v60 = vadd.f32 %v4710_v48, %v4181_v33 }
0x1f47   :  { %v6523_v57 = vadd.f32 %v4710_v48, %v4180_v56 }
0x1f48   :  { %v4191_v61 = vsel %vm118_vm2, %v6525_v60, 0.0 }
0x1f49   :  { %v4188_v53 = vsel %vm118_vm2, %v6523_v57, 0.0 }
0x1f4a   :  { %4189 = vadd.xlane.f32.xlu0 %v4188_v53 }
0x1f4e   :  { %4192 = vadd.xlane.f32.xlu0 %v4191_v61 }
0x1fd7   :  { %v4190_v27 = vpop.xlane.xlu0 %4189 }
0x1fd8   :  { %v4194_v62 = vmul.f32 0.03125, %v4190_v27  ;;  %v4422_v27 = vld [vmem:[%s6614_s2 + $0x158] sm:$0xff] }
0x1fda   :  { %v4196_v25 = vsub.f32 %v6523_v57, %v4194_v62  ;;  %v4423_v62 = vld [vmem:[%s6614_s2 + $0x160] sm:$0xff] }
0x1fdb   :  { %v4193_v63 = vpop.xlane.xlu0 %4192 }
0x1fdc   :  { %v4195_v7 = vmul.f32 0.03125, %v4193_v63  ;;  %v4198_v0 = vmul.f32 %v4196_v25, %v4196_v25  ;;  %v4716_v63 = vld [vmem:[%s6616_s3 + $0x2f] ss:$0 sm:$0xff] }
0x1fde   :  { %v4197_v39 = vsub.f32 %v6525_v60, %v4195_v7  ;;  %v4200_v1 = vsel %vm118_vm2, %v4198_v0, 0.0 }
0x1fdf   :  { %4201 = vadd.xlane.f32.xlu0 %v4200_v1 }
0x1fe0   :  { %v4199_v3 = vmul.f32 %v4197_v39, %v4197_v39 }
0x1fe2   :  { %v4203_v5 = vsel %vm118_vm2, %v4199_v3, 0.0 }
0x1fe3   :  { %4204 = vadd.xlane.f32.xlu0 %v4203_v5 }
0x206c   :  { %v4202_v13 = vpop.xlane.xlu0 %4201 }
0x206d   :  { %v4206_v14 = vmul.f32 0.03125, %v4202_v13 }
0x206f   :  { %v4208_v15 = vadd.f32 1e-05, %v4206_v14 }
0x2070   :  { %v4205_v16 = vpop.xlane.xlu0 %4204 }
0x2071   :  { %5790 = vrsqrt.f32 %v4208_v15  ;;  %v4207_v17 = vmul.f32 0.03125, %v4205_v16 }
0x2073   :  { %v4209_v19 = vadd.f32 1e-05, %v4207_v17 }
0x2075   :  { %5792 = vrsqrt.f32 %v4209_v19 }
0x207b   :  { %v5791_v20 = vpop.eup %5790 }
0x207c   :  { %v4212_v18 = vmul.f32 %v5791_v20, %v4196_v25  ;;  %v5661_v25 = vpack.c.bf16 %v4423_v62, %v4422_v27 }
0x207e   :  { %v4218_v58 = vmul.f32 %v4711_v21, %v4212_v18  ;;  %5662 = vmatprep.subr.bf16.mxu1 %v5661_v25 }
0x207f   :  { %v5793_v59 = vpop.eup %5792  ;;  %5664 = vmatpush3.bf16.msra.mxu1 %v5661_v25 }
0x2080   :  { %v4213_v26 = vmul.f32 %v5793_v59, %v4197_v39  ;;  %v4224_v23 = vadd.f32 %v4712_v22, %v4218_v58 }
0x2082   :  { %v4219_v2 = vmul.f32 %v4711_v21, %v4213_v26  ;;  %5352 = vmatprep.mubr.msk.f32.mxu0 %vm118_vm2, %v4224_v23 }
0x2084   :  { %v4225_v31 = vadd.f32 %v4712_v22, %v4219_v2 }
0x2086   :  { %5353 = vmatmul.mubr.msk.f32.vlgmr.msra.gmra.mrb[38].mxu0 %vm118_vm2, %v4225_v31 }
0x2087   :  { %5644 = vmatpush3.bf16.msra.mxu0 %v5641_v36 }
0x2088   :  { %5646 = vmatprep.subr.bf16.mxu0 %v5645_v8 }
0x208b   :  { %5648 = vmatpush3.bf16.msra.mxu0 %v5645_v8 }
0x208c   :  { %5650 = vmatprep.subr.bf16.mxu0 %v5649_v42 }
0x208f   :  { %5652 = vmatpush3.bf16.msra.mxu0 %v5649_v42 }
0x2090   :  { %5654 = vmatprep.subr.bf16.mxu0 %v5653_v43 }
0x2093   :  { %5656 = vmatpush3.bf16.msra.mxu0 %v5653_v43 }
0x2159   :  { %v5354_v49 = vpop.f32.mrb[38].mxu0 }
0x215a   :  { %v4320_v50 = vadd.f32 %v5354_v49, %v4713_v47  ;;  %v4314_v51 = vpop.f32.mrb[39].mxu0 }
0x215b   :  { %v4315_v52 = vadd.f32 %v4713_v47, %v4314_v51 }
0x215c   :  { %v4326_v54 = vmul.f32 0.70710677, %v4320_v50  ;;  %v4324_v56 = vmul.f32 0.5, %v4320_v50 }
0x215d   :  { %v4325_v32 = vmul.f32 0.70710677, %v4315_v52  ;;  %v4323_v55 = vmul.f32 0.5, %v4315_v52 }
0x215e   :  { %5794 = verf.f32 %v4326_v54 }
0x215f   :  { %5796 = verf.f32 %v4325_v32 }
0x2168   :  { %v5795_v24 = vpop.eup %5794 }
0x2169   :  { %v5797_v34 = vpop.eup %5796  ;;  %v4330_v48 = vadd.f32 1.0, %v5795_v24 }
0x216a   :  { %v4329_v33 = vadd.f32 1.0, %v5797_v34 }
0x216b   :  { %v4332_v61 = vmul.f32 %v4330_v48, %v4324_v56 }
0x216c   :  { %v4331_v53 = vmul.f32 %v4329_v33, %v4323_v55 }
0x216e   :  { %5371 = vmatprep.mubr.msk.f32.mxu0 %vm2183_vm6, %v4331_v53 }
0x216f   :  { %5372 = vmatmul.mubr.msk.f32.vlgmr.msra.gmra.mrb[40].mxu0 %vm2183_vm6, %v4332_v61 }
0x2242   :  { %v5373_v7 = vpop.f32.mrb[40].mxu0 }
0x2243   :  { %v4415_v0 = vadd.f32 %v5373_v7, %v4716_v63  ;;  %v4409_v39 = vpop.f32.mrb[41].mxu0 }
0x2244   :  { %v4410_v1 = vadd.f32 %v4716_v63, %v4409_v39 }
0x2245   :  { %v4419_v5 = vadd.f32 %v4415_v0, %v6525_v60 }
0x2246   :  { %v4418_v3 = vadd.f32 %v4410_v1, %v6523_v57 }
0x2248   :  { %5382 = vmatprep.mubr.msk.f32.mxu1 %vm118_vm2, %v4418_v3 }
0x2249   :  { %5383 = vmatmul.mubr.msk.f32.vlgmr.msra.gmra.mrb[40].mxu1 %vm118_vm2, %v4419_v5 }
0x231c   :  { %v5384_v41 = vpop.f32.mrb[40].mxu1 }
0x231d   :  { %v4507_v9 = vadd.f32 %v5384_v41, %v4719_v6  ;;  %v4501_v10 = vpop.f32.mrb[41].mxu1 }
0x231e   :  { %v4502_v11 = vadd.f32 %v4719_v6, %v4501_v10 }
0x231f   :  { %4511 = vst.msk [vmem:[%s6618_s4 + $0x8] sm:$0xff] %vm416_vm3, %v4507_v9 }
0x2320   :  { %4510 = vst.msk [vmem:[%s6618_s4] sm:$0xff] %vm416_vm3, %v4502_v11 }

</bundles_post_ra>
